<compile_context>
chip_gen: v7x
topology: tpu7x:2x2x1
jax: 0.10.0
libtpu: 0.0.40
codegen_flags: <defaults>
</compile_context>

<pallas_src>
import functools

import jax
import jax.numpy as jnp
from jax.experimental import pallas as pl
from jax.experimental.pallas import tpu as pltpu

ZS_DIM = 512
HIDDEN = 512
LANE = 128
SUB = 16          # bf16 sublane packing -> keep row tiles 16-aligned
MAX_TB = 1024     # batch-tile cap (amortizes ~0.35 us/step grid overhead)


def _round_up(x: int, m: int) -> int:
    return ((x + m - 1) // m) * m


def _choose_tile(batch: int):
    """Pick (tile_rows, padded_batch): big tiles, but >=2 grid steps for v7x."""
    tb = min(MAX_TB, _round_up(max(batch, 1), SUB))
    pb = _round_up(batch, tb)
    if pb // tb < 2 and batch > SUB:
        tb = _round_up((pb + 1) // 2, SUB)
        pb = _round_up(batch, tb)
    return tb, pb


def _mlp_logits(zs_ref, w1_ref, b1_ref, w2_ref, b2_ref, w3_ref, b3_ref, pre_ref):
    """Shared 3-layer MLP body. Writes pre_activ, returns f32 (padded) logits."""
    zs = zs_ref[...].astype(jnp.bfloat16)

    h1 = jnp.dot(zs, w1_ref[...], preferred_element_type=jnp.float32) + b1_ref[...]
    h1 = jnp.maximum(h1, 0.0)

    h2 = jnp.dot(h1.astype(jnp.bfloat16), w2_ref[...],
                 preferred_element_type=jnp.float32) + b2_ref[...]
    h2 = jnp.maximum(h2, 0.0)
    pre_ref[...] = h2.astype(pre_ref.dtype)

    logits = jnp.dot(h2.astype(jnp.bfloat16), w3_ref[...],
                     preferred_element_type=jnp.float32) + b3_ref[...]
    return logits


def _policy_kernel_tanh(zs_ref, w1_ref, b1_ref, w2_ref, b2_ref, w3_ref, b3_ref,
                        x_ref, pre_ref):
    logits = _mlp_logits(zs_ref, w1_ref, b1_ref, w2_ref, b2_ref, w3_ref, b3_ref,
                         pre_ref)
    x_ref[...] = jnp.tanh(logits).astype(x_ref.dtype)


def _policy_kernel_gumbel(zs_ref, g_ref, w1_ref, b1_ref, w2_ref, b2_ref,
                          w3_ref, b3_ref, x_ref, pre_ref, *, inv_tau):
    logits = _mlp_logits(zs_ref, w1_ref, b1_ref, w2_ref, b2_ref, w3_ref, b3_ref,
                         pre_ref)
    # gumbel_softmax(tau, hard=False): softmax((logits + g) / tau, axis=-1).
    # Padded logit lanes carry bias -1e30 so they contribute exactly 0.
    y = (logits + g_ref[...]) * inv_tau
    y = y - jnp.max(y, axis=-1, keepdims=True)
    e = jnp.exp(y)
    x_ref[...] = (e / jnp.sum(e, axis=-1, keepdims=True)).astype(x_ref.dtype)


class PolicyNetworkPallas:
    """Pallas-TPU equivalent of the PyTorch PolicyNetwork."""

    def __init__(self, action_dim: int, discrete_action_space: bool, key):
        self.action_dim = action_dim
        self.discrete = discrete_action_space
        self.tau = 10.0
        self.action_pad = max(LANE, _round_up(action_dim, LANE))  # lane-dense head

        ks = jax.random.split(key, 6)

        def linear_params(kw, kb, fan_in, fan_out):
            # PyTorch nn.Linear default init: U(-1/sqrt(fan_in), 1/sqrt(fan_in))
            bound = 1.0 / (fan_in ** 0.5)
            w = jax.random.uniform(kw, (fan_in, fan_out), jnp.float32, -bound, bound)
            b = jax.random.uniform(kb, (1, fan_out), jnp.float32, -bound, bound)
            return w, b

        w1, b1 = linear_params(ks[0], ks[1], ZS_DIM, HIDDEN)
        w2, b2 = linear_params(ks[2], ks[3], HIDDEN, HIDDEN)
        w3, b3 = linear_params(ks[4], ks[5], HIDDEN, action_dim)

        # Pad layer-3 to a lane-dense (128-multiple) output.  Padded weight
        # columns are zero; padded bias columns are -1e30 in the discrete case
        # so the padded logits vanish under the f32 softmax.
        w3_p = jnp.zeros((HIDDEN, self.action_pad), jnp.float32)
        w3_p = w3_p.at[:, :action_dim].set(w3)
        pad_bias = -1e30 if discrete_action_space else 0.0
        b3_p = jnp.full((1, self.action_pad), pad_bias, jnp.float32)
        b3_p = b3_p.at[:, :action_dim].set(b3)

        # bf16 weights (halves weight DMA, native MXU dtype), f32 biases.
        self.w1 = w1.astype(jnp.bfloat16)
        self.w2 = w2.astype(jnp.bfloat16)
        self.w3 = w3_p.astype(jnp.bfloat16)
        self.b1, self.b2, self.b3 = b1, b2, b3_p

    def __call__(self, zs, key=None):
        batch = zs.shape[0]
        tb, pb = _choose_tile(batch)
        a_pad = self.action_pad

        # bf16 at the pallas_call boundary: halves zs HBM traffic, and the MXU
        # consumes bf16 anyway (reference matmul casts the same way).
        zs = zs.astype(jnp.bfloat16)
        if pb != batch:
            zs = jnp.pad(zs, ((0, pb - batch), (0, 0)))
        grid = (pb // tb,)

        def row_spec(cols):        # batch-tiled activations / outputs
            return pl.BlockSpec((tb, cols), lambda i: (i, 0))

        def resident_spec(shape):  # weights / biases stay put across the grid
            return pl.BlockSpec(shape, lambda i: (0, 0))

        weight_specs = [
            resident_spec((ZS_DIM, HIDDEN)), resident_spec((1, HIDDEN)),
            resident_spec((HIDDEN, HIDDEN)), resident_spec((1, HIDDEN)),
            resident_spec((HIDDEN, a_pad)), resident_spec((1, a_pad)),
        ]
        compiler_params = pltpu.CompilerParams(
            dimension_semantics=("parallel",),
            vmem_limit_bytes=48 * 1024 * 1024,
        )
        out_shape = (
            jax.ShapeDtypeStruct((pb, a_pad), jnp.float32),    # x (lane-dense head)
            jax.ShapeDtypeStruct((pb, HIDDEN), jnp.bfloat16),  # pre_activ (byte-reduced)
        )
        out_specs = (row_spec(a_pad), row_spec(HIDDEN))

        if self.discrete:
            if key is None:
                key = jax.random.PRNGKey(0)
            # Gumbel(0,1) noise, generated once per call; padded lanes are
            # irrelevant (their bias is -1e30).
            g = jax.random.gumbel(key, (pb, a_pad), jnp.float32)
            kernel = functools.partial(_policy_kernel_gumbel, inv_tau=1.0 / self.tau)
            x, pre = pl.pallas_call(
                kernel,
                out_shape=out_shape,
                grid=grid,
                in_specs=[row_spec(ZS_DIM), row_spec(a_pad)] + weight_specs,
                out_specs=out_specs,
                compiler_params=compiler_params,
            )(zs, g, self.w1, self.b1, self.w2, self.b2, self.w3, self.b3)
            return (x[:batch, :self.action_dim], pre[:batch], g[:batch])
        else:
            x, pre = pl.pallas_call(
                _policy_kernel_tanh,
                out_shape=out_shape,
                grid=grid,
                in_specs=[row_spec(ZS_DIM)] + weight_specs,
                out_specs=out_specs,
                compiler_params=compiler_params,
            )(zs, self.w1, self.b1, self.w2, self.b2, self.w3, self.b3)
            return x[:batch, :self.action_dim], pre[:batch]


def _reference(net, zs, gumbel):
    """Pure-JAX reference with the same bf16-input / f32-accumulate matmuls."""
    def lin(x, w, b):
        return jnp.dot(x.astype(jnp.bfloat16), w,
                       preferred_element_type=jnp.float32) + b

    a = net.action_dim
    h1 = jax.nn.relu(lin(zs, net.w1, net.b1))
    h2 = jax.nn.relu(lin(h1, net.w2, net.b2))
    logits = lin(h2, net.w3[:, :a], net.b3[:, :a])
    if net.discrete:
        x = jax.nn.softmax((logits + gumbel[:, :a]) / net.tau, axis=-1)
    else:
        x = jnp.tanh(logits)
    return x, h2


if __name__ == "__main__":
    key = jax.random.PRNGKey(0)
    k_param, k_zs, k_gum = jax.random.split(key, 3)

    batch = 2
    action_dim = 6
    zs = jax.random.normal(k_zs, (batch, ZS_DIM), jnp.float32)

    # Continuous action space (tanh head)
    net_c = PolicyNetworkPallas(action_dim, discrete_action_space=False, key=k_param)
    x_c, pre_c = net_c(zs)
    jax.block_until_ready((x_c, pre_c))

    # Discrete action space (gumbel-softmax head, tau=10)
    net_d = PolicyNetworkPallas(action_dim, discrete_action_space=True, key=k_param)
    x_d, pre_d, g_d = net_d(zs, key=k_gum)
    jax.block_until_ready((x_d, pre_d, g_d))

    # Silent correctness checks against a pure-JAX reference (bf16-matched).
    xr_c, pr_c = _reference(net_c, zs, None)
    xr_d, pr_d = _reference(net_d, zs, g_d)
    assert x_c.shape == (batch, action_dim) and pre_c.shape == (batch, HIDDEN)
    assert x_d.shape == (batch, action_dim) and pre_d.shape == (batch, HIDDEN)
    assert jnp.allclose(x_c, xr_c, atol=2e-2), "continuous head mismatch"
    assert jnp.allclose(pre_c.astype(jnp.float32), pr_c, atol=2e-2), \
        "pre_activ mismatch (continuous)"
    assert jnp.allclose(x_d, xr_d, atol=2e-2), "discrete head mismatch"
    assert jnp.allclose(pre_d.astype(jnp.float32), pr_d, atol=2e-2), \
        "pre_activ mismatch (discrete)"
    assert jnp.allclose(jnp.sum(x_d, axis=-1), 1.0, atol=1e-3), \
        "softmax rows must sum to 1"
    assert bool(jnp.all(x_d >= 0.0)), "softmax must be non-negative"

    print("KERNEL_OK")
</pallas_src>

<mosaic_0001>
module attributes {stable_mosaic.version = 11 : i64} {
  func.func @_policy_kernel_tanh(%arg0: i32, %arg1: memref<16x512xbf16, #tpu.memory_space<vmem>>, %arg2: memref<512x512xbf16, #tpu.memory_space<vmem>>, %arg3: memref<1x512xf32, #tpu.memory_space<vmem>>, %arg4: memref<512x512xbf16, #tpu.memory_space<vmem>>, %arg5: memref<1x512xf32, #tpu.memory_space<vmem>>, %arg6: memref<512x128xbf16, #tpu.memory_space<vmem>>, %arg7: memref<1x128xf32, #tpu.memory_space<vmem>>, %arg8: memref<16x128xf32, #tpu.memory_space<vmem>>, %arg9: memref<16x512xbf16, #tpu.memory_space<vmem>>) attributes {dimension_semantics = [#tpu.dimension_semantics<parallel>], iteration_bounds = array<i64: 1>, scalar_prefetch = 0 : i64, scratch_operands = 0 : i64, tpu.core_type = #tpu.core_type<tc>, window_params = [{transform_indices = @transform_0, window_bounds = array<i64: 16, 512>}, {pipeline_mode = #tpu.pipeline_mode<synchronous>, transform_indices = @transform_1, window_bounds = array<i64: 512, 512>}, {pipeline_mode = #tpu.pipeline_mode<synchronous>, transform_indices = @transform_2, window_bounds = array<i64: 1, 512>}, {pipeline_mode = #tpu.pipeline_mode<synchronous>, transform_indices = @transform_3, window_bounds = array<i64: 512, 512>}, {pipeline_mode = #tpu.pipeline_mode<synchronous>, transform_indices = @transform_4, window_bounds = array<i64: 1, 512>}, {pipeline_mode = #tpu.pipeline_mode<synchronous>, transform_indices = @transform_5, window_bounds = array<i64: 512, 128>}, {pipeline_mode = #tpu.pipeline_mode<synchronous>, transform_indices = @transform_6, window_bounds = array<i64: 1, 128>}, {transform_indices = @transform_7, window_bounds = array<i64: 16, 128>}, {transform_indices = @transform_8, window_bounds = array<i64: 16, 512>}]} {
    %c0 = arith.constant 0 : index
    %c0_0 = arith.constant 0 : index
    %0 = vector.load %arg1[%c0, %c0_0] : memref<16x512xbf16, #tpu.memory_space<vmem>>, vector<16x512xbf16>
    %c0_1 = arith.constant 0 : index
    %c0_2 = arith.constant 0 : index
    %1 = vector.load %arg2[%c0_1, %c0_2] : memref<512x512xbf16, #tpu.memory_space<vmem>>, vector<512x512xbf16>
    %cst = arith.constant dense<0.000000e+00> : vector<16x512xf32>
    %2 = tpu.matmul %0, %1, %cst {dimension_numbers = #tpu.dot_dimension_numbers<[1], [0], [0], [1], [0, 0, 1, 1], [], []>} : vector<16x512xbf16>, vector<512x512xbf16>, vector<16x512xf32> -> vector<16x512xf32>
    %c0_3 = arith.constant 0 : index
    %c0_4 = arith.constant 0 : index
    %3 = vector.load %arg3[%c0_3, %c0_4] : memref<1x512xf32, #tpu.memory_space<vmem>>, vector<1x512xf32>
    %4 = vector.broadcast %3 : vector<1x512xf32> to vector<16x512xf32>
    %5 = arith.addf %2, %4 : vector<16x512xf32>
    %cst_5 = arith.constant 0.000000e+00 : f32
    %6 = vector.broadcast %cst_5 : f32 to vector<16x512xf32>
    %7 = arith.maximumf %5, %6 : vector<16x512xf32>
    %8 = arith.truncf %7 : vector<16x512xf32> to vector<16x512xbf16>
    %c0_6 = arith.constant 0 : index
    %c0_7 = arith.constant 0 : index
    %9 = vector.load %arg4[%c0_6, %c0_7] : memref<512x512xbf16, #tpu.memory_space<vmem>>, vector<512x512xbf16>
    %cst_8 = arith.constant dense<0.000000e+00> : vector<16x512xf32>
    %10 = tpu.matmul %8, %9, %cst_8 {dimension_numbers = #tpu.dot_dimension_numbers<[1], [0], [0], [1], [0, 0, 1, 1], [], []>} : vector<16x512xbf16>, vector<512x512xbf16>, vector<16x512xf32> -> vector<16x512xf32>
    %c0_9 = arith.constant 0 : index
    %c0_10 = arith.constant 0 : index
    %11 = vector.load %arg5[%c0_9, %c0_10] : memref<1x512xf32, #tpu.memory_space<vmem>>, vector<1x512xf32>
    %12 = vector.broadcast %11 : vector<1x512xf32> to vector<16x512xf32>
    %13 = arith.addf %10, %12 : vector<16x512xf32>
    %cst_11 = arith.constant 0.000000e+00 : f32
    %14 = vector.broadcast %cst_11 : f32 to vector<16x512xf32>
    %15 = arith.maximumf %13, %14 : vector<16x512xf32>
    %16 = arith.truncf %15 : vector<16x512xf32> to vector<16x512xbf16>
    %c0_12 = arith.constant 0 : index
    %c0_13 = arith.constant 0 : index
    %17 = vector.load %arg9[%c0_12, %c0_13] : memref<16x512xbf16, #tpu.memory_space<vmem>>, vector<16x512xbf16>
    tpu.vector_store %arg9[%c0_12, %c0_13], %16 {strides = array<i32>} : memref<16x512xbf16, #tpu.memory_space<vmem>>, vector<16x512xbf16>,
    %18 = arith.truncf %15 : vector<16x512xf32> to vector<16x512xbf16>
    %c0_14 = arith.constant 0 : index
    %c0_15 = arith.constant 0 : index
    %19 = vector.load %arg6[%c0_14, %c0_15] : memref<512x128xbf16, #tpu.memory_space<vmem>>, vector<512x128xbf16>
    %cst_16 = arith.constant dense<0.000000e+00> : vector<16x128xf32>
    %20 = tpu.matmul %18, %19, %cst_16 {dimension_numbers = #tpu.dot_dimension_numbers<[1], [0], [0], [1], [0, 0, 1, 1], [], []>} : vector<16x512xbf16>, vector<512x128xbf16>, vector<16x128xf32> -> vector<16x128xf32>
    %c0_17 = arith.constant 0 : index
    %c0_18 = arith.constant 0 : index
    %21 = vector.load %arg7[%c0_17, %c0_18] : memref<1x128xf32, #tpu.memory_space<vmem>>, vector<1x128xf32>
    %22 = vector.broadcast %21 : vector<1x128xf32> to vector<16x128xf32>
    %23 = arith.addf %20, %22 : vector<16x128xf32>
    %24 = math.tanh %23 : vector<16x128xf32>
    %c0_19 = arith.constant 0 : index
    %c0_20 = arith.constant 0 : index
    %25 = vector.load %arg8[%c0_19, %c0_20] : memref<16x128xf32, #tpu.memory_space<vmem>>, vector<16x128xf32>
    tpu.vector_store %arg8[%c0_19, %c0_20], %24 {strides = array<i32>} : memref<16x128xf32, #tpu.memory_space<vmem>>, vector<16x128xf32>,
    return
  }
  func.func @transform_0(%arg0: i32) -> (i32, i32) {
    %c0_i32 = arith.constant 0 : i32
    %c0_i32_0 = arith.constant 0 : i32
    return %arg0, %c0_i32 : i32, i32
  }
  func.func @transform_1(%arg0: i32) -> (i32, i32) {
    %c0_i32 = arith.constant 0 : i32
    %c0_i32_0 = arith.constant 0 : i32
    %c0_i32_1 = arith.constant 0 : i32
    return %c0_i32, %c0_i32_0 : i32, i32
  }
  func.func @transform_2(%arg0: i32) -> (i32, i32) {
    %c0_i32 = arith.constant 0 : i32
    %c0_i32_0 = arith.constant 0 : i32
    %c0_i32_1 = arith.constant 0 : i32
    return %c0_i32, %c0_i32_0 : i32, i32
  }
  func.func @transform_3(%arg0: i32) -> (i32, i32) {
    %c0_i32 = arith.constant 0 : i32
    %c0_i32_0 = arith.constant 0 : i32
    %c0_i32_1 = arith.constant 0 : i32
    return %c0_i32, %c0_i32_0 : i32, i32
  }
  func.func @transform_4(%arg0: i32) -> (i32, i32) {
    %c0_i32 = arith.constant 0 : i32
    %c0_i32_0 = arith.constant 0 : i32
    %c0_i32_1 = arith.constant 0 : i32
    return %c0_i32, %c0_i32_0 : i32, i32
  }
  func.func @transform_5(%arg0: i32) -> (i32, i32) {
    %c0_i32 = arith.constant 0 : i32
    %c0_i32_0 = arith.constant 0 : i32
    %c0_i32_1 = arith.constant 0 : i32
    return %c0_i32, %c0_i32_0 : i32, i32
  }
  func.func @transform_6(%arg0: i32) -> (i32, i32) {
    %c0_i32 = arith.constant 0 : i32
    %c0_i32_0 = arith.constant 0 : i32
    %c0_i32_1 = arith.constant 0 : i32
    return %c0_i32, %c0_i32_0 : i32, i32
  }
  func.func @transform_7(%arg0: i32) -> (i32, i32) {
    %c0_i32 = arith.constant 0 : i32
    %c0_i32_0 = arith.constant 0 : i32
    return %arg0, %c0_i32 : i32, i32
  }
  func.func @transform_8(%arg0: i32) -> (i32, i32) {
    %c0_i32 = arith.constant 0 : i32
    %c0_i32_0 = arith.constant 0 : i32
    return %arg0, %c0_i32 : i32, i32
  }
}

</mosaic_0001>

<bundles_post_ra>
// kernel: tpu_custom_call.1
= control target key start
LH: loop header
LB: loop body
LE: loop exit
PB: predicated region body
PF: predicated region fallthrough
CT: control target
= control target key end

     0   :  { %14 = vsyncpa [#allocation3], 0  ;;  %s3613_s0 = inlined_call_operand.hbm [shape: bf16[16,512], index: 0, kind: input, shape index: {}]   ;;  %s3614_s1 = inlined_call_operand.hbm [shape: bf16[512,512], index: 1, kind: input, shape index: {}]   ;;  %s3615_s2 = inlined_call_operand.vmem [shape: f32[1,512], index: 2, kind: input, shape index: {}]   ;;  %s3616_s3 = inlined_call_operand.hbm [shape: bf16[512,512], index: 3, kind: input, shape index: {}]   ;;  %s3617_s4 = inlined_call_operand.vmem [shape: f32[1,512], index: 4, kind: input, shape index: {}]   ;;  %s3618_s5 = inlined_call_operand.hbm [shape: bf16[512,128], index: 5, kind: input, shape index: {}]   ;;  %s3619_s6 = inlined_call_operand.vmem [shape: f32[1,128], index: 6, kind: input, shape index: {}]   ;;  %s3620_s7 = inlined_call_operand.hbm [shape: f32[16,128], index: 7, kind: output, shape index: {0}]   ;;  %s3621_s8 = inlined_call_operand.hbm [shape: bf16[16,512], index: 8, kind: output, shape index: {1}]  }
   0x1   :  { %15 = vsyncpa [#allocation6], 0 }
   0x2   :  { %16 = vsyncpa [#allocation9], 0 }
   0x3   :  { %17 = vsyncpa [#allocation4], 0 }
   0x4   :  { %18 = vsyncpa [#allocation12], 0  ;;  %s3423_s27 = smov [#allocation5]   ;;  %s3424_s29 = smov [#allocation2]  }
   0x5   :  { %s36_s28 = sshll.u32 %s3423_s27, 4  ;;  %s24_s30 = sshll.u32 %s3424_s29, 4  ;;  %s37_s28 = int_to_ptr.vmem [resolvable:$true] %s36_s28  ;;  %s3480_s30 = int_to_ptr.vmem [resolvable:$true] %s24_s30 }
   0x6   :  { %s3281_s11 = scalar_lea.hbm %s3614_s1, 16384 }
   0x7   :  { %p3282_p0 = scmp.ne.s32.totalorder %s3614_s1, %s3281_s11  ;;  %p3285_p1 = scmp.lt.u32.totalorder %s3281_s11, %s3614_s1 }
   0x9   :  { %p3287_p2 = pnand %p3285_p1, %p3282_p0 }
   0xb   :  { %3290 = shalt.err (!%p3287_p2)
}
   0xc   :  { %s3291_s16 = scalar_lea.vmem %s37_s28, 16384  ;;  %p3296_p4 = scmp.lt.s32.totalorder %s37_s28, %s37_s28 }
   0xd   :  { %p3292_p3 = scmp.ne.s32.totalorder %s37_s28, %s3291_s16  ;;  %p3297_p5 = scmp.lt.s32.totalorder %s3291_s16, %s3291_s16 }
   0xf   :  { %p3298_p6 = por %p3297_p5, %p3296_p4 }
  0x11   :  { %p3299_p7 = pnand %p3298_p6, %p3292_p3 }
  0x13   :  { %3302 = shalt.err (!%p3299_p7)
}
  0x14   :  { %s3425_s17 = smov 256   ;;  %s3426_s18 = smov 16  }
  0x15   :  { %42 = dma.hbm_to_vmem [thread:$0]  %s3614_s1, 16384, %s37_s28, [#allocation6], %s3425_s17, %s3425_s17, %s3426_s18  }
  0x16   :  { %s3303_s23 = scalar_lea.hbm %s3613_s0, 512 }
  0x17   :  { %p3304_p8 = scmp.ne.s32.totalorder %s3613_s0, %s3303_s23  ;;  %p3307_p9 = scmp.lt.u32.totalorder %s3303_s23, %s3613_s0 }
  0x19   :  { %p3309_p10 = pnand %p3307_p9, %p3304_p8 }
  0x1b   :  { %3312 = shalt.err (!%p3309_p10)
}
  0x1c   :  { %s3313_s29 = scalar_lea.vmem %s3480_s30, 512  ;;  %p3318_p12 = scmp.lt.s32.totalorder %s3480_s30, %s3480_s30 }
  0x1d   :  { %p3314_p11 = scmp.ne.s32.totalorder %s3480_s30, %s3313_s29  ;;  %p3319_p13 = scmp.lt.s32.totalorder %s3313_s29, %s3313_s29 }
  0x1f   :  { %p3320_p0 = por %p3319_p13, %p3318_p12 }
  0x21   :  { %p3321_p1 = pnand %p3320_p0, %p3314_p11 }
  0x23   :  { %3324 = shalt.err (!%p3321_p1)
}
  0x24   :  { %30 = dma.hbm_to_vmem [thread:$0]  %s3613_s0, 512, %s3480_s30, [#allocation3], %s3425_s17, %s3425_s17, %s3426_s18  }
  0x25   :  { %s3427_s9 = smov [#allocation7]   ;;  %s3428_s11 = smov [#allocation8]  }
  0x26   :  { %s50_s10 = sshll.u32 %s3427_s9, 4  ;;  %s64_s12 = sshll.u32 %s3428_s11, 4  ;;  %s51_s10 = int_to_ptr.vmem [resolvable:$true] %s50_s10  ;;  %s3517_s12 = int_to_ptr.vmem [resolvable:$true] %s64_s12 }
  0x27   :  { %s3325_s15 = scalar_lea.hbm %s3616_s3, 16384 }
  0x28   :  { %p3326_p2 = scmp.ne.s32.totalorder %s3616_s3, %s3325_s15  ;;  %p3329_p3 = scmp.lt.u32.totalorder %s3325_s15, %s3616_s3 }
  0x2a   :  { %p3331_p4 = pnand %p3329_p3, %p3326_p2 }
  0x2c   :  { %3334 = shalt.err (!%p3331_p4)
}
  0x2d   :  { %s3335_s0 = scalar_lea.vmem %s51_s10, 16384  ;;  %p3340_p6 = scmp.lt.s32.totalorder %s51_s10, %s51_s10 }
  0x2e   :  { %p3336_p5 = scmp.ne.s32.totalorder %s51_s10, %s3335_s0  ;;  %p3341_p7 = scmp.lt.s32.totalorder %s3335_s0, %s3335_s0 }
  0x30   :  { %p3342_p8 = por %p3341_p7, %p3340_p6 }
  0x32   :  { %p3343_p9 = pnand %p3342_p8, %p3336_p5 }
  0x34   :  { %3346 = shalt.err (!%p3343_p9)
}
  0x35   :  { %56 = dma.hbm_to_vmem [thread:$0]  %s3616_s3, 16384, %s51_s10, [#allocation6], %s3425_s17, %s3425_s17, %s3426_s18  }
  0x36   :  { %s3347_s25 = scalar_lea.hbm %s3618_s5, 4096 }
  0x37   :  { %p3348_p10 = scmp.ne.s32.totalorder %s3618_s5, %s3347_s25  ;;  %p3351_p11 = scmp.lt.u32.totalorder %s3347_s25, %s3618_s5 }
  0x39   :  { %p3353_p12 = pnand %p3351_p11, %p3348_p10 }
  0x3b   :  { %3356 = shalt.err (!%p3353_p12)
}
  0x3c   :  { %s3357_s28 = scalar_lea.vmem %s3517_s12, 4096  ;;  %p3362_p0 = scmp.lt.s32.totalorder %s3517_s12, %s3517_s12 }
  0x3d   :  { %p3358_p13 = scmp.ne.s32.totalorder %s3517_s12, %s3357_s28  ;;  %p3363_p1 = scmp.lt.s32.totalorder %s3357_s28, %s3357_s28 }
  0x3f   :  { %p3364_p2 = por %p3363_p1, %p3362_p0 }
  0x41   :  { %p3365_p3 = pnand %p3364_p2, %p3358_p13 }
  0x43   :  { %3368 = shalt.err (!%p3365_p3)
}
  0x44   :  { %s3429_s3 = smov 64   ;;  %s3430_s9 = smov 4  }
  0x45   :  { %70 = dma.hbm_to_vmem [thread:$0]  %s3618_s5, 4096, %s3517_s12, [#allocation9], %s3429_s3, %s3429_s3, %s3430_s9  }
  0x46   :  { %3413 = dma.done.wait [#allocation3], 512  }
  0x47   :  { %3414 = vsyncadd [#allocation3], 4294966784 }
  0x48   :  { %3415 = dma.done.wait [#allocation6], 32768  }
  0x49   :  { %3416 = vsyncadd [#allocation6], 4294934528 }
  0x4a   :  { %3417 = dma.done.wait [#allocation9], 4096  }
  0x4b   :  { %3418 = vsyncadd [#allocation9], 4294963200  ;;  %v2855_v0 = vld [vmem:[#allocation5 + $0x4] ss:$16 sps:$4 sm:$0xff]   ;;  %v2857_v1 = vld [vmem:[#allocation5 + $0xc] ss:$16 sps:$4 sm:$0xff]  }
  0x4c   :  { %900 = vmatprep.subr.bf16.mxu0 %v2855_v0  ;;  %v2859_v2 = vld [vmem:[#allocation5] ss:$16 sps:$4 sm:$0xff]   ;;  %v2860_v3 = vld [vmem:[#allocation5 + $0x8] ss:$16 sps:$4 sm:$0xff]   ;;  %986 = vmatprep.subr.bf16.mxu1 %v2857_v1  ;;  %v2861_v4 = vld [vmem:[#allocation5 + $0x24] ss:$16 sps:$4 sm:$0xff]  }
  0x4d   :  { %901 = vmatpush1.bf16.msra.mxu0 %v2859_v2  ;;  %987 = vmatpush1.bf16.msra.mxu1 %v2860_v3  ;;  %v2863_v5 = vld [vmem:[#allocation5 + $0x2c] ss:$16 sps:$4 sm:$0xff]   ;;  %v2865_v6 = vld [vmem:[#allocation5 + $0x20] ss:$16 sps:$4 sm:$0xff]   ;;  %v2866_v7 = vld [vmem:[#allocation5 + $0x28] ss:$16 sps:$4 sm:$0xff]  }
  0x4e   :  { %902 = vmatprep.subr.bf16.mxu0 %v2861_v4  ;;  %988 = vmatprep.subr.bf16.mxu1 %v2863_v5  ;;  %v2867_v8 = vld [vmem:[#allocation5 + $0x44] ss:$16 sps:$4 sm:$0xff]   ;;  %v2869_v9 = vld [vmem:[#allocation5 + $0x4c] ss:$16 sps:$4 sm:$0xff]   ;;  %v2871_v10 = vld [vmem:[#allocation5 + $0x40] ss:$16 sps:$4 sm:$0xff]  }
  0x4f   :  { %v2872_v11 = vld [vmem:[#allocation5 + $0x48] ss:$16 sps:$4 sm:$0xff]   ;;  %v2873_v12 = vld [vmem:[#allocation5 + $0x64] ss:$16 sps:$4 sm:$0xff]   ;;  %v2875_v13 = vld [vmem:[#allocation5 + $0x6c] ss:$16 sps:$4 sm:$0xff]  }
  0x50   :  { %v2877_v14 = vld [vmem:[#allocation5 + $0x60] ss:$16 sps:$4 sm:$0xff]   ;;  %v2878_v15 = vld [vmem:[#allocation5 + $0x68] ss:$16 sps:$4 sm:$0xff]   ;;  %v2879_v16 = vld [vmem:[#allocation5 + $0x84] ss:$16 sps:$4 sm:$0xff]  }
  0x51   :  { %903 = vmatpush1.bf16.msra.mxu0 %v2865_v6  ;;  %989 = vmatpush1.bf16.msra.mxu1 %v2866_v7  ;;  %v2881_v17 = vld [vmem:[#allocation5 + $0x8c] ss:$16 sps:$4 sm:$0xff]   ;;  %v2883_v18 = vld [vmem:[#allocation5 + $0x80] ss:$16 sps:$4 sm:$0xff]   ;;  %v2884_v19 = vld [vmem:[#allocation5 + $0x88] ss:$16 sps:$4 sm:$0xff]  }
  0x52   :  { %904 = vmatprep.subr.bf16.mxu0 %v2867_v8  ;;  %990 = vmatprep.subr.bf16.mxu1 %v2869_v9  ;;  %v2885_v20 = vld [vmem:[#allocation5 + $0xa4] ss:$16 sps:$4 sm:$0xff]   ;;  %v2887_v21 = vld [vmem:[#allocation5 + $0xac] ss:$16 sps:$4 sm:$0xff]   ;;  %v2889_v22 = vld [vmem:[#allocation5 + $0xa0] ss:$16 sps:$4 sm:$0xff]  }
  0x53   :  { %v2890_v23 = vld [vmem:[#allocation5 + $0xa8] ss:$16 sps:$4 sm:$0xff]   ;;  %v2891_v24 = vld [vmem:[#allocation5 + $0xc4] ss:$16 sps:$4 sm:$0xff]   ;;  %v2893_v25 = vld [vmem:[#allocation5 + $0xcc] ss:$16 sps:$4 sm:$0xff]  }
  0x54   :  { %v2895_v26 = vld [vmem:[#allocation5 + $0xc0] ss:$16 sps:$4 sm:$0xff]   ;;  %v2896_v27 = vld [vmem:[#allocation5 + $0xc8] ss:$16 sps:$4 sm:$0xff]   ;;  %v2897_v28 = vld [vmem:[#allocation5 + $0xe4] ss:$16 sps:$4 sm:$0xff]  }
  0x55   :  { %905 = vmatpush1.bf16.msra.mxu0 %v2871_v10  ;;  %991 = vmatpush1.bf16.msra.mxu1 %v2872_v11  ;;  %v2899_v29 = vld [vmem:[#allocation5 + $0xec] ss:$16 sps:$4 sm:$0xff]   ;;  %v2901_v30 = vld [vmem:[#allocation5 + $0xe0] ss:$16 sps:$4 sm:$0xff]   ;;  %v2902_v31 = vld [vmem:[#allocation5 + $0xe8] ss:$16 sps:$4 sm:$0xff]  }
  0x56   :  { %906 = vmatprep.subr.bf16.mxu0 %v2873_v12  ;;  %992 = vmatprep.subr.bf16.mxu1 %v2875_v13  ;;  %v2903_v32 = vld [vmem:[#allocation5 + $0x104] ss:$16 sps:$4 sm:$0xff]   ;;  %v2905_v33 = vld [vmem:[#allocation5 + $0x10c] ss:$16 sps:$4 sm:$0xff]   ;;  %v2907_v34 = vld [vmem:[#allocation5 + $0x100] ss:$16 sps:$4 sm:$0xff]  }
  0x57   :  { %v2908_v35 = vld [vmem:[#allocation5 + $0x108] ss:$16 sps:$4 sm:$0xff]   ;;  %v2909_v36 = vld [vmem:[#allocation5 + $0x124] ss:$16 sps:$4 sm:$0xff]   ;;  %v2911_v37 = vld [vmem:[#allocation5 + $0x12c] ss:$16 sps:$4 sm:$0xff]  }
  0x58   :  { %v2913_v38 = vld [vmem:[#allocation5 + $0x120] ss:$16 sps:$4 sm:$0xff]   ;;  %v2914_v39 = vld [vmem:[#allocation5 + $0x128] ss:$16 sps:$4 sm:$0xff]   ;;  %v2915_v40 = vld [vmem:[#allocation5 + $0x144] ss:$16 sps:$4 sm:$0xff]  }
  0x59   :  { %907 = vmatpush1.bf16.msra.mxu0 %v2877_v14  ;;  %993 = vmatpush1.bf16.msra.mxu1 %v2878_v15  ;;  %v2917_v41 = vld [vmem:[#allocation5 + $0x14c] ss:$16 sps:$4 sm:$0xff]   ;;  %v2919_v42 = vld [vmem:[#allocation5 + $0x140] ss:$16 sps:$4 sm:$0xff]   ;;  %v2920_v43 = vld [vmem:[#allocation5 + $0x148] ss:$16 sps:$4 sm:$0xff]  }
  0x5a   :  { %908 = vmatprep.subr.bf16.mxu0 %v2879_v16  ;;  %994 = vmatprep.subr.bf16.mxu1 %v2881_v17  ;;  %v2921_v44 = vld [vmem:[#allocation5 + $0x164] ss:$16 sps:$4 sm:$0xff]   ;;  %v2923_v45 = vld [vmem:[#allocation5 + $0x16c] ss:$16 sps:$4 sm:$0xff]   ;;  %v2925_v46 = vld [vmem:[#allocation5 + $0x160] ss:$16 sps:$4 sm:$0xff]  }
  0x5b   :  { %v2926_v47 = vld [vmem:[#allocation5 + $0x168] ss:$16 sps:$4 sm:$0xff]   ;;  %v2953_v48 = vld [vmem:[#allocation2 + $0x4] ss:$16 sps:$4 sm:$0xff]   ;;  %v2929_v50 = vld [vmem:[#allocation5 + $0x18c] ss:$16 sps:$4 sm:$0xff]  }
  0x5c   :  { %v2927_v49 = vld [vmem:[#allocation5 + $0x184] ss:$16 sps:$4 sm:$0xff]   ;;  %932 = vmatprep.mubr.bf16.mxu0 %v2953_v48  ;;  %1018 = vmatprep.mubr.bf16.mxu1 %v2953_v48  ;;  %v2931_v51 = vld [vmem:[#allocation5 + $0x180] ss:$16 sps:$4 sm:$0xff]   ;;  %v2932_v52 = vld [vmem:[#allocation5 + $0x188] ss:$16 sps:$4 sm:$0xff]  }
  0x5d   :  { %909 = vmatpush1.bf16.msra.mxu0 %v2883_v18  ;;  %995 = vmatpush1.bf16.msra.mxu1 %v2884_v19  ;;  %v2933_v53 = vld [vmem:[#allocation5 + $0x1a4] ss:$16 sps:$4 sm:$0xff]   ;;  %v2935_v54 = vld [vmem:[#allocation5 + $0x1ac] ss:$16 sps:$4 sm:$0xff]   ;;  %v2937_v55 = vld [vmem:[#allocation5 + $0x1a0] ss:$16 sps:$4 sm:$0xff]  }
  0x5e   :  { %910 = vmatprep.subr.bf16.mxu0 %v2885_v20  ;;  %996 = vmatprep.subr.bf16.mxu1 %v2887_v21  ;;  %v2938_v56 = vld [vmem:[#allocation5 + $0x1a8] ss:$16 sps:$4 sm:$0xff]   ;;  %v2939_v57 = vld [vmem:[#allocation5 + $0x1c4] ss:$16 sps:$4 sm:$0xff]   ;;  %v2941_v58 = vld [vmem:[#allocation5 + $0x1cc] ss:$16 sps:$4 sm:$0xff]  }
  0x5f   :  { %v2943_v59 = vld [vmem:[#allocation5 + $0x1c0] ss:$16 sps:$4 sm:$0xff]   ;;  %v2944_v60 = vld [vmem:[#allocation5 + $0x1c8] ss:$16 sps:$4 sm:$0xff]   ;;  %v2945_v61 = vld [vmem:[#allocation5 + $0x1e4] ss:$16 sps:$4 sm:$0xff]  }
  0x60   :  { %v2947_v62 = vld [vmem:[#allocation5 + $0x1ec] ss:$16 sps:$4 sm:$0xff]   ;;  %v2949_v63 = vld [vmem:[#allocation5 + $0x1e0] ss:$16 sps:$4 sm:$0xff]   ;;  %v2950_v0 = vld [vmem:[#allocation5 + $0x1e8] ss:$16 sps:$4 sm:$0xff]  }
  0x61   :  { %911 = vmatpush1.bf16.msra.mxu0 %v2889_v22  ;;  %997 = vmatpush1.bf16.msra.mxu1 %v2890_v23  ;;  %v2956_v1 = vld [vmem:[#allocation5 + $0x204] ss:$16 sps:$4 sm:$0xff]   ;;  %v2959_v2 = vld [vmem:[#allocation5 + $0x20c] ss:$16 sps:$4 sm:$0xff]   ;;  %v2951_v3 = vld [vmem:[#allocation2] ss:$16 sps:$4 sm:$0xff]  }
  0x62   :  { %912 = vmatprep.subr.bf16.mxu0 %v2891_v24  ;;  %998 = vmatprep.subr.bf16.mxu1 %v2893_v25  ;;  %v2954_v4 = vld [vmem:[#allocation5 + $0x200] ss:$16 sps:$4 sm:$0xff]   ;;  %v2957_v5 = vld [vmem:[#allocation5 + $0x208] ss:$16 sps:$4 sm:$0xff]   ;;  %v2962_v6 = vld [vmem:[#allocation5 + $0x224] ss:$16 sps:$4 sm:$0xff]  }
  0x63   :  { %v2965_v7 = vld [vmem:[#allocation5 + $0x22c] ss:$16 sps:$4 sm:$0xff]   ;;  %v2960_v8 = vld [vmem:[#allocation5 + $0x220] ss:$16 sps:$4 sm:$0xff]   ;;  %v2963_v9 = vld [vmem:[#allocation5 + $0x228] ss:$16 sps:$4 sm:$0xff]  }
  0x64   :  { %v2968_v10 = vld [vmem:[#allocation5 + $0x244] ss:$16 sps:$4 sm:$0xff]   ;;  %v2971_v11 = vld [vmem:[#allocation5 + $0x24c] ss:$16 sps:$4 sm:$0xff]   ;;  %v2966_v12 = vld [vmem:[#allocation5 + $0x240] ss:$16 sps:$4 sm:$0xff]  }
  0x65   :  { %913 = vmatpush1.bf16.msra.mxu0 %v2895_v26  ;;  %999 = vmatpush1.bf16.msra.mxu1 %v2896_v27  ;;  %v2969_v13 = vld [vmem:[#allocation5 + $0x248] ss:$16 sps:$4 sm:$0xff]   ;;  %v2974_v14 = vld [vmem:[#allocation5 + $0x264] ss:$16 sps:$4 sm:$0xff]   ;;  %v2977_v15 = vld [vmem:[#allocation5 + $0x26c] ss:$16 sps:$4 sm:$0xff]  }
  0x66   :  { %914 = vmatprep.subr.bf16.mxu0 %v2897_v28  ;;  %1000 = vmatprep.subr.bf16.mxu1 %v2899_v29  ;;  %v2972_v16 = vld [vmem:[#allocation5 + $0x260] ss:$16 sps:$4 sm:$0xff]   ;;  %v2975_v17 = vld [vmem:[#allocation5 + $0x268] ss:$16 sps:$4 sm:$0xff]   ;;  %v2980_v18 = vld [vmem:[#allocation5 + $0x284] ss:$16 sps:$4 sm:$0xff]  }
  0x67   :  { %v2983_v19 = vld [vmem:[#allocation5 + $0x28c] ss:$16 sps:$4 sm:$0xff]   ;;  %v2978_v20 = vld [vmem:[#allocation5 + $0x280] ss:$16 sps:$4 sm:$0xff]   ;;  %v2981_v21 = vld [vmem:[#allocation5 + $0x288] ss:$16 sps:$4 sm:$0xff]  }
  0x68   :  { %v2986_v22 = vld [vmem:[#allocation5 + $0x2a4] ss:$16 sps:$4 sm:$0xff]   ;;  %v2989_v23 = vld [vmem:[#allocation5 + $0x2ac] ss:$16 sps:$4 sm:$0xff]   ;;  %v2984_v24 = vld [vmem:[#allocation5 + $0x2a0] ss:$16 sps:$4 sm:$0xff]  }
  0x69   :  { %915 = vmatpush1.bf16.msra.mxu0 %v2901_v30  ;;  %1001 = vmatpush1.bf16.msra.mxu1 %v2902_v31  ;;  %v2987_v25 = vld [vmem:[#allocation5 + $0x2a8] ss:$16 sps:$4 sm:$0xff]   ;;  %v2992_v26 = vld [vmem:[#allocation5 + $0x2c4] ss:$16 sps:$4 sm:$0xff]   ;;  %v2995_v27 = vld [vmem:[#allocation5 + $0x2cc] ss:$16 sps:$4 sm:$0xff]  }
  0x6a   :  { %916 = vmatprep.subr.bf16.mxu0 %v2903_v32  ;;  %1002 = vmatprep.subr.bf16.mxu1 %v2905_v33  ;;  %v2990_v28 = vld [vmem:[#allocation5 + $0x2c0] ss:$16 sps:$4 sm:$0xff]   ;;  %v2993_v29 = vld [vmem:[#allocation5 + $0x2c8] ss:$16 sps:$4 sm:$0xff]   ;;  %v3052_v30 = vld [vmem:[#allocation2 + $0xc] ss:$16 sps:$4 sm:$0xff]  }
  0x6b   :  { %v2998_v31 = vld [vmem:[#allocation5 + $0x2e4] ss:$16 sps:$4 sm:$0xff]   ;;  %v3001_v32 = vld [vmem:[#allocation5 + $0x2ec] ss:$16 sps:$4 sm:$0xff]   ;;  %v2996_v33 = vld [vmem:[#allocation5 + $0x2e0] ss:$16 sps:$4 sm:$0xff]  }
  0x6c   :  { %v3025_v48 = vld [vmem:[#allocation5 + $0x36c] ss:$16 sps:$4 sm:$0xff]  }
  0x6d   :  { %917 = vmatpush1.bf16.msra.mxu0 %v2907_v34  ;;  %1003 = vmatpush1.bf16.msra.mxu1 %v2908_v35  ;;  %v2999_v34 = vld [vmem:[#allocation5 + $0x2e8] ss:$16 sps:$4 sm:$0xff]   ;;  %v3004_v35 = vld [vmem:[#allocation5 + $0x304] ss:$16 sps:$4 sm:$0xff]  }
  0x6e   :  { %918 = vmatprep.subr.bf16.mxu0 %v2909_v36  ;;  %1004 = vmatprep.subr.bf16.mxu1 %v2911_v37  ;;  %v3007_v36 = vld [vmem:[#allocation5 + $0x30c] ss:$16 sps:$4 sm:$0xff]   ;;  %v3002_v37 = vld [vmem:[#allocation5 + $0x300] ss:$16 sps:$4 sm:$0xff]  }
  0x71   :  { %919 = vmatpush1.bf16.msra.mxu0 %v2913_v38  ;;  %1005 = vmatpush1.bf16.msra.mxu1 %v2914_v39  ;;  %v3005_v38 = vld [vmem:[#allocation5 + $0x308] ss:$16 sps:$4 sm:$0xff]   ;;  %v3010_v39 = vld [vmem:[#allocation5 + $0x324] ss:$16 sps:$4 sm:$0xff]  }
  0x72   :  { %920 = vmatprep.subr.bf16.mxu0 %v2915_v40  ;;  %1006 = vmatprep.subr.bf16.mxu1 %v2917_v41  ;;  %v3013_v40 = vld [vmem:[#allocation5 + $0x32c] ss:$16 sps:$4 sm:$0xff]   ;;  %v3008_v41 = vld [vmem:[#allocation5 + $0x320] ss:$16 sps:$4 sm:$0xff]  }
  0x75   :  { %921 = vmatpush1.bf16.msra.mxu0 %v2919_v42  ;;  %1007 = vmatpush1.bf16.msra.mxu1 %v2920_v43  ;;  %v3011_v42 = vld [vmem:[#allocation5 + $0x328] ss:$16 sps:$4 sm:$0xff]   ;;  %v3016_v43 = vld [vmem:[#allocation5 + $0x344] ss:$16 sps:$4 sm:$0xff]  }
  0x76   :  { %922 = vmatprep.subr.bf16.mxu0 %v2921_v44  ;;  %1008 = vmatprep.subr.bf16.mxu1 %v2923_v45  ;;  %v3019_v44 = vld [vmem:[#allocation5 + $0x34c] ss:$16 sps:$4 sm:$0xff]   ;;  %v3014_v45 = vld [vmem:[#allocation5 + $0x340] ss:$16 sps:$4 sm:$0xff]  }
  0x79   :  { %923 = vmatpush1.bf16.msra.mxu0 %v2925_v46  ;;  %1009 = vmatpush1.bf16.msra.mxu1 %v2926_v47  ;;  %v3017_v46 = vld [vmem:[#allocation5 + $0x348] ss:$16 sps:$4 sm:$0xff]   ;;  %v3022_v47 = vld [vmem:[#allocation5 + $0x364] ss:$16 sps:$4 sm:$0xff]  }
  0x7a   :  { %924 = vmatprep.subr.bf16.mxu0 %v2927_v49  ;;  %1010 = vmatprep.subr.bf16.mxu1 %v2929_v50  ;;  %v3020_v49 = vld [vmem:[#allocation5 + $0x360] ss:$16 sps:$4 sm:$0xff]   ;;  %v3023_v50 = vld [vmem:[#allocation5 + $0x368] ss:$16 sps:$4 sm:$0xff]  }
  0x7d   :  { %925 = vmatpush1.bf16.msra.mxu0 %v2931_v51  ;;  %1011 = vmatpush1.bf16.msra.mxu1 %v2932_v52  ;;  %v3028_v51 = vld [vmem:[#allocation5 + $0x384] ss:$16 sps:$4 sm:$0xff]   ;;  %v3031_v52 = vld [vmem:[#allocation5 + $0x38c] ss:$16 sps:$4 sm:$0xff]  }
  0x7e   :  { %926 = vmatprep.subr.bf16.mxu0 %v2933_v53  ;;  %1012 = vmatprep.subr.bf16.mxu1 %v2935_v54  ;;  %v3026_v53 = vld [vmem:[#allocation5 + $0x380] ss:$16 sps:$4 sm:$0xff]   ;;  %v3029_v54 = vld [vmem:[#allocation5 + $0x388] ss:$16 sps:$4 sm:$0xff]  }
  0x81   :  { %927 = vmatpush1.bf16.msra.mxu0 %v2937_v55  ;;  %1013 = vmatpush1.bf16.msra.mxu1 %v2938_v56  ;;  %v3034_v55 = vld [vmem:[#allocation5 + $0x3a4] ss:$16 sps:$4 sm:$0xff]   ;;  %v3037_v56 = vld [vmem:[#allocation5 + $0x3ac] ss:$16 sps:$4 sm:$0xff]  }
  0x82   :  { %928 = vmatprep.subr.bf16.mxu0 %v2939_v57  ;;  %1014 = vmatprep.subr.bf16.mxu1 %v2941_v58  ;;  %v3032_v57 = vld [vmem:[#allocation5 + $0x3a0] ss:$16 sps:$4 sm:$0xff]   ;;  %v3035_v58 = vld [vmem:[#allocation5 + $0x3a8] ss:$16 sps:$4 sm:$0xff]  }
  0x85   :  { %929 = vmatpush1.bf16.msra.mxu0 %v2943_v59  ;;  %1015 = vmatpush1.bf16.msra.mxu1 %v2944_v60  ;;  %v3040_v59 = vld [vmem:[#allocation5 + $0x3c4] ss:$16 sps:$4 sm:$0xff]   ;;  %v3043_v60 = vld [vmem:[#allocation5 + $0x3cc] ss:$16 sps:$4 sm:$0xff]  }
  0x86   :  { %930 = vmatprep.subr.bf16.mxu0 %v2945_v61  ;;  %1016 = vmatprep.subr.bf16.mxu1 %v2947_v62  ;;  %v3038_v61 = vld [vmem:[#allocation5 + $0x3c0] ss:$16 sps:$4 sm:$0xff]   ;;  %v3041_v62 = vld [vmem:[#allocation5 + $0x3c8] ss:$16 sps:$4 sm:$0xff]  }
  0x89   :  { %931 = vmatpush1.bf16.msra.mxu0 %v2949_v63  ;;  %1017 = vmatpush1.bf16.msra.mxu1 %v2950_v0  ;;  %v3046_v63 = vld [vmem:[#allocation5 + $0x3e4] ss:$16 sps:$4 sm:$0xff]   ;;  %v3049_v0 = vld [vmem:[#allocation5 + $0x3ec] ss:$16 sps:$4 sm:$0xff]  }
  0x8a   :  { %943 = vmatprep.subr.bf16.mxu0 %v2956_v1  ;;  %1029 = vmatprep.subr.bf16.mxu1 %v2959_v2  ;;  %v3044_v1 = vld [vmem:[#allocation5 + $0x3e0] ss:$16 sps:$4 sm:$0xff]   ;;  %v3047_v2 = vld [vmem:[#allocation5 + $0x3e8] ss:$16 sps:$4 sm:$0xff]  }
  0x8c   :  { %933 = vmatmul.mubr.bf16.vlgmr.msra.gmra.mrb[0].mxu0 %v2951_v3  ;;  %1019 = vmatmul.mubr.bf16.vlgmr.msra.gmra.mrb[0].mxu1 %v2951_v3  ;;  %v3050_v3 = vld [vmem:[#allocation2 + $0x8] ss:$16 sps:$4 sm:$0xff]  }
  0x8d   :  { %944 = vmatpush1.bf16.msra.mxu0 %v2954_v4  ;;  %1030 = vmatpush1.bf16.msra.mxu1 %v2957_v5  ;;  %v3055_v4 = vld [vmem:[#allocation7 + $0x4] ss:$16 sps:$4 sm:$0xff]   ;;  %v3058_v5 = vld [vmem:[#allocation7 + $0xc] ss:$16 sps:$4 sm:$0xff]  }
  0x8e   :  { %945 = vmatprep.subr.bf16.mxu0 %v2962_v6  ;;  %1031 = vmatprep.subr.bf16.mxu1 %v2965_v7  ;;  %v3053_v6 = vld [vmem:[#allocation7] ss:$16 sps:$4 sm:$0xff]   ;;  %v3056_v7 = vld [vmem:[#allocation7 + $0x8] ss:$16 sps:$4 sm:$0xff]  }
  0x8f   :  { %975 = vmatprep.mubr.bf16.mxu0 %v3052_v30  ;;  %1061 = vmatprep.mubr.bf16.mxu1 %v3052_v30  ;;  %v3089_v30 = vld [vmem:[#allocation7 + $0xc0] ss:$16 sps:$4 sm:$0xff]  }
  0x91   :  { %946 = vmatpush1.bf16.msra.mxu0 %v2960_v8  ;;  %1032 = vmatpush1.bf16.msra.mxu1 %v2963_v9  ;;  %v3061_v8 = vld [vmem:[#allocation7 + $0x24] ss:$16 sps:$4 sm:$0xff]   ;;  %v3064_v9 = vld [vmem:[#allocation7 + $0x2c] ss:$16 sps:$4 sm:$0xff]  }
  0x92   :  { %947 = vmatprep.subr.bf16.mxu0 %v2968_v10  ;;  %1033 = vmatprep.subr.bf16.mxu1 %v2971_v11  ;;  %v3059_v10 = vld [vmem:[#allocation7 + $0x20] ss:$16 sps:$4 sm:$0xff]   ;;  %v3062_v11 = vld [vmem:[#allocation7 + $0x28] ss:$16 sps:$4 sm:$0xff]  }
  0x95   :  { %948 = vmatpush1.bf16.msra.mxu0 %v2966_v12  ;;  %1034 = vmatpush1.bf16.msra.mxu1 %v2969_v13  ;;  %v3067_v12 = vld [vmem:[#allocation7 + $0x44] ss:$16 sps:$4 sm:$0xff]   ;;  %v3070_v13 = vld [vmem:[#allocation7 + $0x4c] ss:$16 sps:$4 sm:$0xff]  }
  0x96   :  { %949 = vmatprep.subr.bf16.mxu0 %v2974_v14  ;;  %1035 = vmatprep.subr.bf16.mxu1 %v2977_v15  ;;  %v3065_v14 = vld [vmem:[#allocation7 + $0x40] ss:$16 sps:$4 sm:$0xff]   ;;  %v3068_v15 = vld [vmem:[#allocation7 + $0x48] ss:$16 sps:$4 sm:$0xff]  }
  0x99   :  { %950 = vmatpush1.bf16.msra.mxu0 %v2972_v16  ;;  %1036 = vmatpush1.bf16.msra.mxu1 %v2975_v17  ;;  %v3073_v16 = vld [vmem:[#allocation7 + $0x64] ss:$16 sps:$4 sm:$0xff]   ;;  %v3076_v17 = vld [vmem:[#allocation7 + $0x6c] ss:$16 sps:$4 sm:$0xff]  }
  0x9a   :  { %951 = vmatprep.subr.bf16.mxu0 %v2980_v18  ;;  %1037 = vmatprep.subr.bf16.mxu1 %v2983_v19  ;;  %v3071_v18 = vld [vmem:[#allocation7 + $0x60] ss:$16 sps:$4 sm:$0xff]   ;;  %v3074_v19 = vld [vmem:[#allocation7 + $0x68] ss:$16 sps:$4 sm:$0xff]  }
  0x9d   :  { %952 = vmatpush1.bf16.msra.mxu0 %v2978_v20  ;;  %1038 = vmatpush1.bf16.msra.mxu1 %v2981_v21  ;;  %v3079_v20 = vld [vmem:[#allocation7 + $0x84] ss:$16 sps:$4 sm:$0xff]   ;;  %v3082_v21 = vld [vmem:[#allocation7 + $0x8c] ss:$16 sps:$4 sm:$0xff]  }
  0x9e   :  { %953 = vmatprep.subr.bf16.mxu0 %v2986_v22  ;;  %1039 = vmatprep.subr.bf16.mxu1 %v2989_v23  ;;  %v3077_v22 = vld [vmem:[#allocation7 + $0x80] ss:$16 sps:$4 sm:$0xff]   ;;  %v3080_v23 = vld [vmem:[#allocation7 + $0x88] ss:$16 sps:$4 sm:$0xff]  }
  0xa1   :  { %954 = vmatpush1.bf16.msra.mxu0 %v2984_v24  ;;  %1040 = vmatpush1.bf16.msra.mxu1 %v2987_v25  ;;  %v3085_v24 = vld [vmem:[#allocation7 + $0xa4] ss:$16 sps:$4 sm:$0xff]   ;;  %v3088_v25 = vld [vmem:[#allocation7 + $0xac] ss:$16 sps:$4 sm:$0xff]  }
  0xa2   :  { %955 = vmatprep.subr.bf16.mxu0 %v2992_v26  ;;  %1041 = vmatprep.subr.bf16.mxu1 %v2995_v27  ;;  %v3083_v26 = vld [vmem:[#allocation7 + $0xa0] ss:$16 sps:$4 sm:$0xff]   ;;  %v3086_v27 = vld [vmem:[#allocation7 + $0xa8] ss:$16 sps:$4 sm:$0xff]  }
  0xa5   :  { %956 = vmatpush1.bf16.msra.mxu0 %v2990_v28  ;;  %1042 = vmatpush1.bf16.msra.mxu1 %v2993_v29  ;;  %v3091_v28 = vld [vmem:[#allocation7 + $0xc4] ss:$16 sps:$4 sm:$0xff]   ;;  %v3094_v29 = vld [vmem:[#allocation7 + $0xcc] ss:$16 sps:$4 sm:$0xff]  }
  0xa6   :  { %957 = vmatprep.subr.bf16.mxu0 %v2998_v31  ;;  %1043 = vmatprep.subr.bf16.mxu1 %v3001_v32  ;;  %v3092_v31 = vld [vmem:[#allocation7 + $0xc8] ss:$16 sps:$4 sm:$0xff]   ;;  %v3097_v32 = vld [vmem:[#allocation7 + $0xe4] ss:$16 sps:$4 sm:$0xff]  }
  0xa9   :  { %958 = vmatpush1.bf16.msra.mxu0 %v2996_v33  ;;  %1044 = vmatpush1.bf16.msra.mxu1 %v2999_v34  ;;  %v3100_v33 = vld [vmem:[#allocation7 + $0xec] ss:$16 sps:$4 sm:$0xff]   ;;  %v3095_v34 = vld [vmem:[#allocation7 + $0xe0] ss:$16 sps:$4 sm:$0xff]  }
  0xaa   :  { %959 = vmatprep.subr.bf16.mxu0 %v3004_v35  ;;  %1045 = vmatprep.subr.bf16.mxu1 %v3007_v36  ;;  %v3098_v35 = vld [vmem:[#allocation7 + $0xe8] ss:$16 sps:$4 sm:$0xff]   ;;  %v3103_v36 = vld [vmem:[#allocation7 + $0x104] ss:$16 sps:$4 sm:$0xff]  }
  0xad   :  { %960 = vmatpush1.bf16.msra.mxu0 %v3002_v37  ;;  %1046 = vmatpush1.bf16.msra.mxu1 %v3005_v38  ;;  %v3106_v37 = vld [vmem:[#allocation7 + $0x10c] ss:$16 sps:$4 sm:$0xff]   ;;  %v3101_v38 = vld [vmem:[#allocation7 + $0x100] ss:$16 sps:$4 sm:$0xff]  }
  0xae   :  { %961 = vmatprep.subr.bf16.mxu0 %v3010_v39  ;;  %1047 = vmatprep.subr.bf16.mxu1 %v3013_v40  ;;  %v3104_v39 = vld [vmem:[#allocation7 + $0x108] ss:$16 sps:$4 sm:$0xff]   ;;  %v3109_v40 = vld [vmem:[#allocation7 + $0x124] ss:$16 sps:$4 sm:$0xff]  }
  0xb1   :  { %962 = vmatpush1.bf16.msra.mxu0 %v3008_v41  ;;  %1048 = vmatpush1.bf16.msra.mxu1 %v3011_v42  ;;  %v3112_v41 = vld [vmem:[#allocation7 + $0x12c] ss:$16 sps:$4 sm:$0xff]   ;;  %v3107_v42 = vld [vmem:[#allocation7 + $0x120] ss:$16 sps:$4 sm:$0xff]  }
  0xb2   :  { %963 = vmatprep.subr.bf16.mxu0 %v3016_v43  ;;  %1049 = vmatprep.subr.bf16.mxu1 %v3019_v44  ;;  %v3110_v43 = vld [vmem:[#allocation7 + $0x128] ss:$16 sps:$4 sm:$0xff]   ;;  %v3115_v44 = vld [vmem:[#allocation7 + $0x144] ss:$16 sps:$4 sm:$0xff]  }
  0xb5   :  { %964 = vmatpush1.bf16.msra.mxu0 %v3014_v45  ;;  %1050 = vmatpush1.bf16.msra.mxu1 %v3017_v46  ;;  %v3118_v45 = vld [vmem:[#allocation7 + $0x14c] ss:$16 sps:$4 sm:$0xff]   ;;  %v3113_v46 = vld [vmem:[#allocation7 + $0x140] ss:$16 sps:$4 sm:$0xff]  }
  0xb6   :  { %965 = vmatprep.subr.bf16.mxu0 %v3022_v47  ;;  %1051 = vmatprep.subr.bf16.mxu1 %v3025_v48  ;;  %v3116_v47 = vld [vmem:[#allocation7 + $0x148] ss:$16 sps:$4 sm:$0xff]   ;;  %v3121_v48 = vld [vmem:[#allocation7 + $0x164] ss:$16 sps:$4 sm:$0xff]  }
  0xb9   :  { %966 = vmatpush1.bf16.msra.mxu0 %v3020_v49  ;;  %1052 = vmatpush1.bf16.msra.mxu1 %v3023_v50  ;;  %v3124_v49 = vld [vmem:[#allocation7 + $0x16c] ss:$16 sps:$4 sm:$0xff]   ;;  %v3119_v50 = vld [vmem:[#allocation7 + $0x160] ss:$16 sps:$4 sm:$0xff]  }
  0xba   :  { %967 = vmatprep.subr.bf16.mxu0 %v3028_v51  ;;  %1053 = vmatprep.subr.bf16.mxu1 %v3031_v52  ;;  %v3122_v51 = vld [vmem:[#allocation7 + $0x168] ss:$16 sps:$4 sm:$0xff]   ;;  %v3127_v52 = vld [vmem:[#allocation7 + $0x184] ss:$16 sps:$4 sm:$0xff]  }
  0xbd   :  { %968 = vmatpush1.bf16.msra.mxu0 %v3026_v53  ;;  %1054 = vmatpush1.bf16.msra.mxu1 %v3029_v54  ;;  %v3130_v53 = vld [vmem:[#allocation7 + $0x18c] ss:$16 sps:$4 sm:$0xff]   ;;  %v3125_v54 = vld [vmem:[#allocation7 + $0x180] ss:$16 sps:$4 sm:$0xff]  }
  0xbe   :  { %969 = vmatprep.subr.bf16.mxu0 %v3034_v55  ;;  %1055 = vmatprep.subr.bf16.mxu1 %v3037_v56  ;;  %v3128_v55 = vld [vmem:[#allocation7 + $0x188] ss:$16 sps:$4 sm:$0xff]   ;;  %v3133_v56 = vld [vmem:[#allocation7 + $0x1a4] ss:$16 sps:$4 sm:$0xff]  }
  0xc1   :  { %970 = vmatpush1.bf16.msra.mxu0 %v3032_v57  ;;  %1056 = vmatpush1.bf16.msra.mxu1 %v3035_v58  ;;  %v3136_v57 = vld [vmem:[#allocation7 + $0x1ac] ss:$16 sps:$4 sm:$0xff]   ;;  %v3131_v58 = vld [vmem:[#allocation7 + $0x1a0] ss:$16 sps:$4 sm:$0xff]  }
  0xc2   :  { %971 = vmatprep.subr.bf16.mxu0 %v3040_v59  ;;  %1057 = vmatprep.subr.bf16.mxu1 %v3043_v60  ;;  %v3134_v59 = vld [vmem:[#allocation7 + $0x1a8] ss:$16 sps:$4 sm:$0xff]   ;;  %v3139_v60 = vld [vmem:[#allocation7 + $0x1c4] ss:$16 sps:$4 sm:$0xff]  }
  0xc5   :  { %972 = vmatpush1.bf16.msra.mxu0 %v3038_v61  ;;  %1058 = vmatpush1.bf16.msra.mxu1 %v3041_v62  ;;  %v3142_v61 = vld [vmem:[#allocation7 + $0x1cc] ss:$16 sps:$4 sm:$0xff]   ;;  %v3137_v62 = vld [vmem:[#allocation7 + $0x1c0] ss:$16 sps:$4 sm:$0xff]  }
  0xc6   :  { %973 = vmatprep.subr.bf16.mxu0 %v3046_v63  ;;  %1059 = vmatprep.subr.bf16.mxu1 %v3049_v0  ;;  %v3140_v63 = vld [vmem:[#allocation7 + $0x1c8] ss:$16 sps:$4 sm:$0xff]   ;;  %v3145_v0 = vld [vmem:[#allocation7 + $0x1e4] ss:$16 sps:$4 sm:$0xff]  }
  0xc9   :  { %974 = vmatpush1.bf16.msra.mxu0 %v3044_v1  ;;  %1060 = vmatpush1.bf16.msra.mxu1 %v3047_v2  ;;  %v3148_v1 = vld [vmem:[#allocation7 + $0x1ec] ss:$16 sps:$4 sm:$0xff]   ;;  %v3143_v2 = vld [vmem:[#allocation7 + $0x1e0] ss:$16 sps:$4 sm:$0xff]  }
  0xca   :  { %1874 = vmatprep.subr.bf16.mxu0 %v3055_v4  ;;  %1960 = vmatprep.subr.bf16.mxu1 %v3058_v5  ;;  %v3151_v4 = vld [vmem:[#allocation7 + $0x204] ss:$16 sps:$4 sm:$0xff]   ;;  %v3154_v5 = vld [vmem:[#allocation7 + $0x20c] ss:$16 sps:$4 sm:$0xff]  }
  0xcc   :  { %976 = vmatmul.mubr.bf16.vlgmr.msra.gmra.mrb[0].mxu0 %v3050_v3  ;;  %1062 = vmatmul.mubr.bf16.vlgmr.msra.gmra.mrb[0].mxu1 %v3050_v3  ;;  %v3146_v3 = vld [vmem:[#allocation7 + $0x1e8] ss:$16 sps:$4 sm:$0xff]  }
  0xcd   :  { %1875 = vmatpush1.bf16.msra.mxu0 %v3053_v6  ;;  %1961 = vmatpush1.bf16.msra.mxu1 %v3056_v7  ;;  %v220_v6 = vlaneseq }
  0xce   :  { %1876 = vmatprep.subr.bf16.mxu0 %v3061_v8  ;;  %1962 = vmatprep.subr.bf16.mxu1 %v3064_v9 }
  0xcf   :  { %v3551_v7 = vshrl.u32 %v220_v6, 7  ;;  %v3188_v6 = vld [vmem:[#allocation7 + $0x2c8] ss:$16 sps:$4 sm:$0xff]  }
  0xd1   :  { %1877 = vmatpush1.bf16.msra.mxu0 %v3059_v10  ;;  %1963 = vmatpush1.bf16.msra.mxu1 %v3062_v11  ;;  %v222_v8 = vsub.s32 0, %v3551_v7  ;;  %v230_v9 = vsub.s32 2, %v3551_v7  ;;  %v218_v10 = vld [vmem:[%s3615_s2] sm:$0xf]  ;;  %v226_v11 = vsub.s32 1, %v3551_v7 }
  0xd2   :  { %1878 = vmatprep.subr.bf16.mxu0 %v3067_v12  ;;  %1964 = vmatprep.subr.bf16.mxu1 %v3070_v13  ;;  %v234_v12 = vsub.s32 3, %v3551_v7 }
  0xd3   :  { %v223_v13 = vrot.slane %v218_v10, %v222_v8 }
  0xd5   :  { %1879 = vmatpush1.bf16.msra.mxu0 %v3065_v14  ;;  %1965 = vmatpush1.bf16.msra.mxu1 %v3068_v15  ;;  %v231_v14 = vrot.slane %v218_v10, %v230_v9  ;;  %v227_v15 = vrot.slane %v218_v10, %v226_v11 }
  0xd6   :  { %1880 = vmatprep.subr.bf16.mxu0 %v3073_v16  ;;  %1966 = vmatprep.subr.bf16.mxu1 %v3076_v17  ;;  %v235_v16 = vrot.slane %v218_v10, %v234_v12  ;;  %v3193_v10 = vld [vmem:[#allocation7 + $0x2e4] ss:$16 sps:$4 sm:$0xff]  }
  0xd9   :  { %1881 = vmatpush1.bf16.msra.mxu0 %v3071_v18  ;;  %1967 = vmatpush1.bf16.msra.mxu1 %v3074_v19 }
  0xda   :  { %1882 = vmatprep.subr.bf16.mxu0 %v3079_v20  ;;  %1968 = vmatprep.subr.bf16.mxu1 %v3082_v21 }
  0xdd   :  { %1883 = vmatpush1.bf16.msra.mxu0 %v3077_v22  ;;  %1969 = vmatpush1.bf16.msra.mxu1 %v3080_v23 }
  0xde   :  { %1884 = vmatprep.subr.bf16.mxu0 %v3085_v24  ;;  %1970 = vmatprep.subr.bf16.mxu1 %v3088_v25 }
  0xe1   :  { %1885 = vmatpush1.bf16.msra.mxu0 %v3083_v26  ;;  %1971 = vmatpush1.bf16.msra.mxu1 %v3086_v27 }
  0xe2   :  { %1886 = vmatprep.subr.bf16.mxu0 %v3091_v28  ;;  %1972 = vmatprep.subr.bf16.mxu1 %v3094_v29 }
  0xe5   :  { %1887 = vmatpush1.bf16.msra.mxu0 %v3089_v30  ;;  %1973 = vmatpush1.bf16.msra.mxu1 %v3092_v31 }
  0xe6   :  { %1888 = vmatprep.subr.bf16.mxu0 %v3097_v32  ;;  %1974 = vmatprep.subr.bf16.mxu1 %v3100_v33 }
  0xe9   :  { %1889 = vmatpush1.bf16.msra.mxu0 %v3095_v34  ;;  %1975 = vmatpush1.bf16.msra.mxu1 %v3098_v35 }
  0xea   :  { %1890 = vmatprep.subr.bf16.mxu0 %v3103_v36  ;;  %1976 = vmatprep.subr.bf16.mxu1 %v3106_v37 }
  0xed   :  { %1891 = vmatpush1.bf16.msra.mxu0 %v3101_v38  ;;  %1977 = vmatpush1.bf16.msra.mxu1 %v3104_v39 }
  0xee   :  { %1892 = vmatprep.subr.bf16.mxu0 %v3109_v40  ;;  %1978 = vmatprep.subr.bf16.mxu1 %v3112_v41 }
  0xf1   :  { %1893 = vmatpush1.bf16.msra.mxu0 %v3107_v42  ;;  %1979 = vmatpush1.bf16.msra.mxu1 %v3110_v43 }
  0xf2   :  { %1894 = vmatprep.subr.bf16.mxu0 %v3115_v44  ;;  %1980 = vmatprep.subr.bf16.mxu1 %v3118_v45  ;;  %v3149_v45 = vld [vmem:[#allocation7 + $0x200] ss:$16 sps:$4 sm:$0xff]  }
  0xf5   :  { %1895 = vmatpush1.bf16.msra.mxu0 %v3113_v46  ;;  %1981 = vmatpush1.bf16.msra.mxu1 %v3116_v47  ;;  %v3152_v46 = vld [vmem:[#allocation7 + $0x208] ss:$16 sps:$4 sm:$0xff]   ;;  %v3157_v47 = vld [vmem:[#allocation7 + $0x224] ss:$16 sps:$4 sm:$0xff]  }
  0xf6   :  { %1896 = vmatprep.subr.bf16.mxu0 %v3121_v48  ;;  %1982 = vmatprep.subr.bf16.mxu1 %v3124_v49  ;;  %v3160_v48 = vld [vmem:[#allocation7 + $0x22c] ss:$16 sps:$4 sm:$0xff]   ;;  %v3155_v49 = vld [vmem:[#allocation7 + $0x220] ss:$16 sps:$4 sm:$0xff]  }
  0xf9   :  { %1897 = vmatpush1.bf16.msra.mxu0 %v3119_v50  ;;  %1983 = vmatpush1.bf16.msra.mxu1 %v3122_v51  ;;  %v3158_v50 = vld [vmem:[#allocation7 + $0x228] ss:$16 sps:$4 sm:$0xff]   ;;  %v3163_v51 = vld [vmem:[#allocation7 + $0x244] ss:$16 sps:$4 sm:$0xff]  }
  0xfa   :  { %1898 = vmatprep.subr.bf16.mxu0 %v3127_v52  ;;  %1984 = vmatprep.subr.bf16.mxu1 %v3130_v53  ;;  %v3166_v52 = vld [vmem:[#allocation7 + $0x24c] ss:$16 sps:$4 sm:$0xff]   ;;  %v3161_v53 = vld [vmem:[#allocation7 + $0x240] ss:$16 sps:$4 sm:$0xff]  }
  0xfd   :  { %1899 = vmatpush1.bf16.msra.mxu0 %v3125_v54  ;;  %1985 = vmatpush1.bf16.msra.mxu1 %v3128_v55  ;;  %v3164_v54 = vld [vmem:[#allocation7 + $0x248] ss:$16 sps:$4 sm:$0xff]   ;;  %v3169_v55 = vld [vmem:[#allocation7 + $0x264] ss:$16 sps:$4 sm:$0xff]  }
  0xfe   :  { %1900 = vmatprep.subr.bf16.mxu0 %v3133_v56  ;;  %1986 = vmatprep.subr.bf16.mxu1 %v3136_v57  ;;  %v3172_v56 = vld [vmem:[#allocation7 + $0x26c] ss:$16 sps:$4 sm:$0xff]   ;;  %v3167_v57 = vld [vmem:[#allocation7 + $0x260] ss:$16 sps:$4 sm:$0xff]  }
 0x101   :  { %1901 = vmatpush1.bf16.msra.mxu0 %v3131_v58  ;;  %1987 = vmatpush1.bf16.msra.mxu1 %v3134_v59  ;;  %v3170_v58 = vld [vmem:[#allocation7 + $0x268] ss:$16 sps:$4 sm:$0xff]   ;;  %v3175_v59 = vld [vmem:[#allocation7 + $0x284] ss:$16 sps:$4 sm:$0xff]  }
 0x102   :  { %1902 = vmatprep.subr.bf16.mxu0 %v3139_v60  ;;  %1988 = vmatprep.subr.bf16.mxu1 %v3142_v61  ;;  %v3178_v60 = vld [vmem:[#allocation7 + $0x28c] ss:$16 sps:$4 sm:$0xff]   ;;  %v3173_v61 = vld [vmem:[#allocation7 + $0x280] ss:$16 sps:$4 sm:$0xff]  }
 0x105   :  { %1903 = vmatpush1.bf16.msra.mxu0 %v3137_v62  ;;  %1989 = vmatpush1.bf16.msra.mxu1 %v3140_v63  ;;  %v3176_v62 = vld [vmem:[#allocation7 + $0x288] ss:$16 sps:$4 sm:$0xff]   ;;  %v3181_v63 = vld [vmem:[#allocation7 + $0x2a4] ss:$16 sps:$4 sm:$0xff]  }
 0x106   :  { %1904 = vmatprep.subr.bf16.mxu0 %v3145_v0  ;;  %1990 = vmatprep.subr.bf16.mxu1 %v3148_v1  ;;  %v3184_v0 = vld [vmem:[#allocation7 + $0x2ac] ss:$16 sps:$4 sm:$0xff]   ;;  %v3179_v1 = vld [vmem:[#allocation7 + $0x2a0] ss:$16 sps:$4 sm:$0xff]  }
 0x109   :  { %1905 = vmatpush1.bf16.msra.mxu0 %v3143_v2  ;;  %1991 = vmatpush1.bf16.msra.mxu1 %v3146_v3  ;;  %v3182_v2 = vld [vmem:[#allocation7 + $0x2a8] ss:$16 sps:$4 sm:$0xff]   ;;  %v3187_v3 = vld [vmem:[#allocation7 + $0x2c4] ss:$16 sps:$4 sm:$0xff]  }
 0x10a   :  { %1917 = vmatprep.subr.bf16.mxu0 %v3151_v4  ;;  %2003 = vmatprep.subr.bf16.mxu1 %v3154_v5  ;;  %v3190_v4 = vld [vmem:[#allocation7 + $0x2cc] ss:$16 sps:$4 sm:$0xff]   ;;  %v3185_v5 = vld [vmem:[#allocation7 + $0x2c0] ss:$16 sps:$4 sm:$0xff]  }
 0x19f   :  { %v977_v17 = vpop.f32.mrb[0].mxu0  ;;  %v1063_v18 = vpop.f32.mrb[0].mxu1 }
 0x1a0   :  { %v2811_v19 = vadd.f32 %v977_v17, %v223_v13  ;;  %v2815_v20 = vadd.f32 %v1063_v18, %v231_v14  ;;  %v979_v21 = vpop.f32.mrb[1].mxu0  ;;  %v1065_v22 = vpop.f32.mrb[1].mxu1  ;;  %v3202_v17 = vld [vmem:[#allocation7 + $0x30c] ss:$16 sps:$4 sm:$0xff]   ;;  %v3197_v18 = vld [vmem:[#allocation7 + $0x300] ss:$16 sps:$4 sm:$0xff]  }
 0x1a1   :  { %v2812_v23 = vadd.f32 %v979_v21, %v227_v15  ;;  %v2816_v24 = vadd.f32 %v1065_v22, %v235_v16  ;;  %v981_v25 = vpop.f32.mrb[2].mxu0  ;;  %v1067_v26 = vpop.f32.mrb[2].mxu1  ;;  %v3208_v21 = vld [vmem:[#allocation7 + $0x32c] ss:$16 sps:$4 sm:$0xff]   ;;  %v3203_v22 = vld [vmem:[#allocation7 + $0x320] ss:$16 sps:$4 sm:$0xff]  }
 0x1a2   :  { %v2813_v27 = vadd.f32 %v981_v25, %v223_v13  ;;  %v2817_v28 = vadd.f32 %v1067_v26, %v231_v14  ;;  %v983_v29 = vpop.f32.mrb[3].mxu0  ;;  %v1069_v30 = vpop.f32.mrb[3].mxu1  ;;  %v1072_v33 = vmax.f32 %v2811_v19, 0.0  ;;  %v1074_v34 = vmax.f32 %v2815_v20, 0.0  ;;  %v3196_v13 = vld [vmem:[#allocation7 + $0x2ec] ss:$16 sps:$4 sm:$0xff]  }
 0x1a3   :  { %v2814_v31 = vadd.f32 %v983_v29, %v227_v15  ;;  %v2818_v32 = vadd.f32 %v1069_v30, %v235_v16  ;;  %v1073_v37 = vmax.f32 %v2812_v23, 0.0  ;;  %v1075_v38 = vmax.f32 %v2816_v24, 0.0  ;;  %v3191_v14 = vld [vmem:[#allocation7 + $0x2e0] ss:$16 sps:$4 sm:$0xff]   ;;  %v3194_v15 = vld [vmem:[#allocation7 + $0x2e8] ss:$16 sps:$4 sm:$0xff]  }
 0x1a4   :  { %v1076_v35 = vmax.f32 %v2813_v27, 0.0  ;;  %v1078_v36 = vmax.f32 %v2817_v28, 0.0  ;;  %v3199_v16 = vld [vmem:[#allocation7 + $0x304] ss:$16 sps:$4 sm:$0xff]   ;;  %v3200_v19 = vld [vmem:[#allocation7 + $0x308] ss:$16 sps:$4 sm:$0xff]  }
 0x1a5   :  { %v1077_v39 = vmax.f32 %v2814_v31, 0.0  ;;  %v1079_v40 = vmax.f32 %v2818_v32, 0.0  ;;  %v3205_v20 = vld [vmem:[#allocation7 + $0x324] ss:$16 sps:$4 sm:$0xff]   ;;  %v3206_v23 = vld [vmem:[#allocation7 + $0x328] ss:$16 sps:$4 sm:$0xff]  }
 0x1a6   :  { %v1080_v41 = vpack.c.bf16 %v1076_v35, %v1072_v33  ;;  %v3568_v42 = vpack.c.bf16 %v1078_v36, %v1074_v34  ;;  %v3211_v24 = vld [vmem:[#allocation7 + $0x344] ss:$16 sps:$4 sm:$0xff]   ;;  %v3214_v25 = vld [vmem:[#allocation7 + $0x34c] ss:$16 sps:$4 sm:$0xff]   ;;  %v3209_v26 = vld [vmem:[#allocation7 + $0x340] ss:$16 sps:$4 sm:$0xff]  }
 0x1a7   :  { %v1081_v43 = vpack.c.bf16 %v1077_v39, %v1073_v37  ;;  %v1083_v44 = vpack.c.bf16 %v1079_v40, %v1075_v38  ;;  %v3212_v27 = vld [vmem:[#allocation7 + $0x348] ss:$16 sps:$4 sm:$0xff]   ;;  %v3217_v28 = vld [vmem:[#allocation7 + $0x364] ss:$16 sps:$4 sm:$0xff]   ;;  %v3220_v29 = vld [vmem:[#allocation7 + $0x36c] ss:$16 sps:$4 sm:$0xff]  }
 0x1a8   :  { %v3215_v30 = vld [vmem:[#allocation7 + $0x360] ss:$16 sps:$4 sm:$0xff]   ;;  %v3218_v31 = vld [vmem:[#allocation7 + $0x368] ss:$16 sps:$4 sm:$0xff]   ;;  %v3223_v32 = vld [vmem:[#allocation7 + $0x384] ss:$16 sps:$4 sm:$0xff]  }
 0x1a9   :  { %1906 = vmatprep.mubr.bf16.mxu0 %v1081_v43  ;;  %1992 = vmatprep.mubr.bf16.mxu1 %v1081_v43  ;;  %v3226_v33 = vld [vmem:[#allocation7 + $0x38c] ss:$16 sps:$4 sm:$0xff]   ;;  %v3221_v34 = vld [vmem:[#allocation7 + $0x380] ss:$16 sps:$4 sm:$0xff]   ;;  %v3224_v35 = vld [vmem:[#allocation7 + $0x388] ss:$16 sps:$4 sm:$0xff]  }
 0x1aa   :  { %1907 = vmatmul.mubr.bf16.vlgmr.msra.gmra.mrb[4].mxu0 %v1080_v41  ;;  %1993 = vmatmul.mubr.bf16.vlgmr.msra.gmra.mrb[4].mxu1 %v1080_v41  ;;  %v3229_v36 = vld [vmem:[#allocation7 + $0x3a4] ss:$16 sps:$4 sm:$0xff]   ;;  %v3232_v37 = vld [vmem:[#allocation7 + $0x3ac] ss:$16 sps:$4 sm:$0xff]   ;;  %v3227_v38 = vld [vmem:[#allocation7 + $0x3a0] ss:$16 sps:$4 sm:$0xff]  }
 0x1ab   :  { %1918 = vmatpush1.bf16.msra.mxu0 %v3149_v45  ;;  %2004 = vmatpush1.bf16.msra.mxu1 %v3152_v46  ;;  %v3230_v39 = vld [vmem:[#allocation7 + $0x3a8] ss:$16 sps:$4 sm:$0xff]   ;;  %v3235_v40 = vld [vmem:[#allocation7 + $0x3c4] ss:$16 sps:$4 sm:$0xff]   ;;  %v3238_v41 = vld [vmem:[#allocation7 + $0x3cc] ss:$16 sps:$4 sm:$0xff]  }
 0x1ac   :  { %1949 = vmatprep.mubr.bf16.mxu0 %v1083_v44  ;;  %2035 = vmatprep.mubr.bf16.mxu1 %v1083_v44  ;;  %v3233_v43 = vld [vmem:[#allocation7 + $0x3c0] ss:$16 sps:$4 sm:$0xff]   ;;  %v3236_v44 = vld [vmem:[#allocation7 + $0x3c8] ss:$16 sps:$4 sm:$0xff]   ;;  %v3241_v45 = vld [vmem:[#allocation7 + $0x3e4] ss:$16 sps:$4 sm:$0xff]  }
 0x1ad   :  { %1919 = vmatprep.subr.bf16.mxu0 %v3157_v47  ;;  %2005 = vmatprep.subr.bf16.mxu1 %v3160_v48  ;;  %v3244_v46 = vld [vmem:[#allocation7 + $0x3ec] ss:$16 sps:$4 sm:$0xff]   ;;  %v3239_v47 = vld [vmem:[#allocation7 + $0x3e0] ss:$16 sps:$4 sm:$0xff]   ;;  %v3242_v48 = vld [vmem:[#allocation7 + $0x3e8] ss:$16 sps:$4 sm:$0xff]  }
 0x1af   :  { %1920 = vmatpush1.bf16.msra.mxu0 %v3155_v49  ;;  %2006 = vmatpush1.bf16.msra.mxu1 %v3158_v50  ;;  %v3245_v49 = vld [vmem:[#allocation8 + $0x40] sm:$0xff]  }
 0x1b0   :  { %1921 = vmatprep.subr.bf16.mxu0 %v3163_v51  ;;  %2007 = vmatprep.subr.bf16.mxu1 %v3166_v52  ;;  %v3246_v50 = vld [vmem:[#allocation8 + $0xc0] sm:$0xff]  }
 0x1b1   :  { %v3247_v51 = vld [vmem:[#allocation8] sm:$0xff]  }
 0x1b2   :  { %v3248_v52 = vld [vmem:[#allocation8 + $0x80] sm:$0xff]  }
 0x1b3   :  { %1922 = vmatpush1.bf16.msra.mxu0 %v3161_v53  ;;  %2008 = vmatpush1.bf16.msra.mxu1 %v3164_v54  ;;  %v3249_v53 = vld [vmem:[#allocation8 + $0x48] sm:$0xff]  }
 0x1b4   :  { %1923 = vmatprep.subr.bf16.mxu0 %v3169_v55  ;;  %2009 = vmatprep.subr.bf16.mxu1 %v3172_v56  ;;  %v3250_v54 = vld [vmem:[#allocation8 + $0xc8] sm:$0xff]  }
 0x1b5   :  { %v3251_v55 = vld [vmem:[#allocation8 + $0x8] sm:$0xff]  }
 0x1b6   :  { %v3252_v56 = vld [vmem:[#allocation8 + $0x88] sm:$0xff]  }
 0x1b7   :  { %1924 = vmatpush1.bf16.msra.mxu0 %v3167_v57  ;;  %2010 = vmatpush1.bf16.msra.mxu1 %v3170_v58  ;;  %v3253_v57 = vld [vmem:[#allocation8 + $0x50] sm:$0xff]  }
 0x1b8   :  { %1925 = vmatprep.subr.bf16.mxu0 %v3175_v59  ;;  %2011 = vmatprep.subr.bf16.mxu1 %v3178_v60  ;;  %v3254_v58 = vld [vmem:[#allocation8 + $0xd0] sm:$0xff]  }
 0x1b9   :  { %v3255_v59 = vld [vmem:[#allocation8 + $0x10] sm:$0xff]  }
 0x1ba   :  { %v3256_v60 = vld [vmem:[#allocation8 + $0x90] sm:$0xff]  }
 0x1bb   :  { %1926 = vmatpush1.bf16.msra.mxu0 %v3173_v61  ;;  %2012 = vmatpush1.bf16.msra.mxu1 %v3176_v62  ;;  %v3257_v61 = vld [vmem:[#allocation8 + $0x58] sm:$0xff]  }
 0x1bc   :  { %1927 = vmatprep.subr.bf16.mxu0 %v3181_v63  ;;  %2013 = vmatprep.subr.bf16.mxu1 %v3184_v0  ;;  %v3258_v62 = vld [vmem:[#allocation8 + $0xd8] sm:$0xff]   ;;  %v3261_v0 = vld [vmem:[#allocation8 + $0x60] sm:$0xff]  }
 0x1bd   :  { %v3259_v63 = vld [vmem:[#allocation8 + $0x18] sm:$0xff]  }
 0x1bf   :  { %1928 = vmatpush1.bf16.msra.mxu0 %v3179_v1  ;;  %2014 = vmatpush1.bf16.msra.mxu1 %v3182_v2  ;;  %v3262_v1 = vld [vmem:[#allocation8 + $0xe0] sm:$0xff]  }
 0x1c0   :  { %1929 = vmatprep.subr.bf16.mxu0 %v3187_v3  ;;  %2015 = vmatprep.subr.bf16.mxu1 %v3190_v4  ;;  %v3263_v2 = vld [vmem:[#allocation8 + $0x20] sm:$0xff]   ;;  %v3265_v4 = vld [vmem:[#allocation8 + $0x68] sm:$0xff]  }
 0x1c1   :  { %v3264_v3 = vld [vmem:[#allocation8 + $0xa0] sm:$0xff]  }
 0x1c3   :  { %1930 = vmatpush1.bf16.msra.mxu0 %v3185_v5  ;;  %2016 = vmatpush1.bf16.msra.mxu1 %v3188_v6  ;;  %v3266_v5 = vld [vmem:[#allocation8 + $0xe8] sm:$0xff]  }
 0x1c4   :  { %1931 = vmatprep.subr.bf16.mxu0 %v3193_v10  ;;  %2017 = vmatprep.subr.bf16.mxu1 %v3196_v13  ;;  %v3267_v6 = vld [vmem:[#allocation8 + $0x28] sm:$0xff]   ;;  %v3269_v13 = vld [vmem:[#allocation8 + $0x70] sm:$0xff]  }
 0x1c5   :  { %v3268_v10 = vld [vmem:[#allocation8 + $0xa8] sm:$0xff]  }
 0x1c7   :  { %1932 = vmatpush1.bf16.msra.mxu0 %v3191_v14  ;;  %2018 = vmatpush1.bf16.msra.mxu1 %v3194_v15  ;;  %v3270_v14 = vld [vmem:[#allocation8 + $0xf0] sm:$0xff]  }
 0x1c8   :  { %1933 = vmatprep.subr.bf16.mxu0 %v3199_v16  ;;  %2019 = vmatprep.subr.bf16.mxu1 %v3202_v17  ;;  %v3271_v15 = vld [vmem:[#allocation8 + $0x30] sm:$0xff]   ;;  %v3273_v17 = vld [vmem:[#allocation8 + $0x78] sm:$0xff]  }
 0x1c9   :  { %v3272_v16 = vld [vmem:[#allocation8 + $0xb0] sm:$0xff]  }
 0x1cb   :  { %1934 = vmatpush1.bf16.msra.mxu0 %v3197_v18  ;;  %2020 = vmatpush1.bf16.msra.mxu1 %v3200_v19  ;;  %v3274_v18 = vld [vmem:[#allocation8 + $0xf8] sm:$0xff]  }
 0x1cc   :  { %1935 = vmatprep.subr.bf16.mxu0 %v3205_v20  ;;  %2021 = vmatprep.subr.bf16.mxu1 %v3208_v21  ;;  %v3275_v19 = vld [vmem:[#allocation8 + $0x38] sm:$0xff]   ;;  %v1212_v21 = vld [vmem:[%s3617_s4] sm:$0xf]  ;;  %s3431_s4 = smov [#allocation11]  }
 0x1cd   :  { %v3276_v20 = vld [vmem:[#allocation8 + $0xb8] sm:$0xff]   ;;  %s2448_s14 = sshll.u32 %s3431_s4, 4  ;;  %s2449_s14 = int_to_ptr.vmem [resolvable:$true] %s2448_s14 }
 0x1ce   :  { %s3369_s15 = scalar_lea.vmem %s2449_s14, 512  ;;  %p3374_p5 = scmp.lt.s32.totalorder %s2449_s14, %s2449_s14 }
 0x1cf   :  { %1936 = vmatpush1.bf16.msra.mxu0 %v3203_v22  ;;  %2022 = vmatpush1.bf16.msra.mxu1 %v3206_v23  ;;  %v1217_v22 = vrot.slane %v1212_v21, %v222_v8  ;;  %v1225_v23 = vrot.slane %v1212_v21, %v230_v9  ;;  %p3370_p4 = scmp.ne.s32.totalorder %s2449_s14, %s3369_s15  ;;  %p3375_p6 = scmp.lt.s32.totalorder %s3369_s15, %s3369_s15 }
 0x1d0   :  { %1937 = vmatprep.subr.bf16.mxu0 %v3211_v24  ;;  %2023 = vmatprep.subr.bf16.mxu1 %v3214_v25  ;;  %v1221_v24 = vrot.slane %v1212_v21, %v226_v11  ;;  %v1229_v25 = vrot.slane %v1212_v21, %v234_v12 }
 0x1d1   :  { %p3376_p7 = por %p3375_p6, %p3374_p5 }
 0x1d3   :  { %1938 = vmatpush1.bf16.msra.mxu0 %v3209_v26  ;;  %2024 = vmatpush1.bf16.msra.mxu1 %v3212_v27  ;;  %p3377_p8 = pnand %p3376_p7, %p3370_p4 }
 0x1d4   :  { %1939 = vmatprep.subr.bf16.mxu0 %v3217_v28  ;;  %2025 = vmatprep.subr.bf16.mxu1 %v3220_v29 }
 0x1d7   :  { %1940 = vmatpush1.bf16.msra.mxu0 %v3215_v30  ;;  %2026 = vmatpush1.bf16.msra.mxu1 %v3218_v31 }
 0x1d8   :  { %1941 = vmatprep.subr.bf16.mxu0 %v3223_v32  ;;  %2027 = vmatprep.subr.bf16.mxu1 %v3226_v33 }
 0x1db   :  { %1942 = vmatpush1.bf16.msra.mxu0 %v3221_v34  ;;  %2028 = vmatpush1.bf16.msra.mxu1 %v3224_v35 }
 0x1dc   :  { %1943 = vmatprep.subr.bf16.mxu0 %v3229_v36  ;;  %2029 = vmatprep.subr.bf16.mxu1 %v3232_v37 }
 0x1df   :  { %1944 = vmatpush1.bf16.msra.mxu0 %v3227_v38  ;;  %2030 = vmatpush1.bf16.msra.mxu1 %v3230_v39 }
 0x1e0   :  { %1945 = vmatprep.subr.bf16.mxu0 %v3235_v40  ;;  %2031 = vmatprep.subr.bf16.mxu1 %v3238_v41 }
 0x1e3   :  { %1946 = vmatpush1.bf16.msra.mxu0 %v3233_v43  ;;  %2032 = vmatpush1.bf16.msra.mxu1 %v3236_v44 }
 0x1e4   :  { %1947 = vmatprep.subr.bf16.mxu0 %v3241_v45  ;;  %2033 = vmatprep.subr.bf16.mxu1 %v3244_v46 }
 0x1e7   :  { %1948 = vmatpush1.bf16.msra.mxu0 %v3239_v47  ;;  %2034 = vmatpush1.bf16.msra.mxu1 %v3242_v48 }
 0x1e8   :  { %2767 = vmatprep.subr.bf16.mxu0 %v3245_v49  ;;  %2789 = vmatprep.subr.bf16.mxu1 %v3246_v50 }
 0x1ea   :  { %1950 = vmatmul.mubr.bf16.vlgmr.msra.gmra.mrb[4].mxu0 %v3568_v42  ;;  %2036 = vmatmul.mubr.bf16.vlgmr.msra.gmra.mrb[4].mxu1 %v3568_v42  ;;  %v3260_v42 = vld [vmem:[#allocation8 + $0x98] sm:$0xff]  }
 0x1eb   :  { %2768 = vmatpush3.bf16.msra.mxu0 %v3247_v51  ;;  %2790 = vmatpush3.bf16.msra.mxu1 %v3248_v52 }
 0x1ec   :  { %2769 = vmatprep.subr.bf16.mxu0 %v3249_v53  ;;  %2791 = vmatprep.subr.bf16.mxu1 %v3250_v54 }
 0x1ef   :  { %2770 = vmatpush3.bf16.msra.mxu0 %v3251_v55  ;;  %2792 = vmatpush3.bf16.msra.mxu1 %v3252_v56 }
 0x1f0   :  { %2771 = vmatprep.subr.bf16.mxu0 %v3253_v57  ;;  %2793 = vmatprep.subr.bf16.mxu1 %v3254_v58 }
 0x1f3   :  { %2772 = vmatpush3.bf16.msra.mxu0 %v3255_v59  ;;  %2794 = vmatpush3.bf16.msra.mxu1 %v3256_v60 }
 0x1f4   :  { %2773 = vmatprep.subr.bf16.mxu0 %v3257_v61  ;;  %2795 = vmatprep.subr.bf16.mxu1 %v3258_v62 }
 0x1f7   :  { %2774 = vmatpush3.bf16.msra.mxu0 %v3259_v63  ;;  %2796 = vmatpush3.bf16.msra.mxu1 %v3260_v42 }
 0x1f8   :  { %2775 = vmatprep.subr.bf16.mxu0 %v3261_v0  ;;  %2797 = vmatprep.subr.bf16.mxu1 %v3262_v1 }
 0x1fb   :  { %2776 = vmatpush3.bf16.msra.mxu0 %v3263_v2  ;;  %2798 = vmatpush3.bf16.msra.mxu1 %v3264_v3 }
 0x1fc   :  { %2777 = vmatprep.subr.bf16.mxu0 %v3265_v4  ;;  %2799 = vmatprep.subr.bf16.mxu1 %v3266_v5 }
 0x1ff   :  { %2778 = vmatpush3.bf16.msra.mxu0 %v3267_v6  ;;  %2800 = vmatpush3.bf16.msra.mxu1 %v3268_v10 }
 0x200   :  { %2779 = vmatprep.subr.bf16.mxu0 %v3269_v13  ;;  %2801 = vmatprep.subr.bf16.mxu1 %v3270_v14 }
 0x203   :  { %2780 = vmatpush3.bf16.msra.mxu0 %v3271_v15  ;;  %2802 = vmatpush3.bf16.msra.mxu1 %v3272_v16 }
 0x204   :  { %2781 = vmatprep.subr.bf16.mxu0 %v3273_v17  ;;  %2803 = vmatprep.subr.bf16.mxu1 %v3274_v18 }
 0x207   :  { %2782 = vmatpush3.bf16.msra.mxu0 %v3275_v19  ;;  %2804 = vmatpush3.bf16.msra.mxu1 %v3276_v20 }
 0x2bd   :  { %v1951_v26 = vpop.f32.mrb[4].mxu0  ;;  %v2037_v27 = vpop.f32.mrb[4].mxu1 }
 0x2be   :  { %v2819_v28 = vadd.f32 %v1951_v26, %v1217_v22  ;;  %v2823_v29 = vadd.f32 %v2037_v27, %v1225_v23  ;;  %v1953_v30 = vpop.f32.mrb[5].mxu0  ;;  %v2039_v31 = vpop.f32.mrb[5].mxu1 }
 0x2bf   :  { %v2820_v32 = vadd.f32 %v1953_v30, %v1221_v24  ;;  %v2824_v33 = vadd.f32 %v2039_v31, %v1229_v25  ;;  %v1955_v34 = vpop.f32.mrb[6].mxu0  ;;  %v2041_v35 = vpop.f32.mrb[6].mxu1 }
 0x2c0   :  { %v2046_v8 = vmax.f32 %v2819_v28, 0.0  ;;  %v2048_v36 = vmax.f32 %v2823_v29, 0.0  ;;  %v2821_v37 = vadd.f32 %v1955_v34, %v1217_v22  ;;  %v2825_v9 = vadd.f32 %v2041_v35, %v1225_v23  ;;  %v1957_v38 = vpop.f32.mrb[7].mxu0  ;;  %v2043_v39 = vpop.f32.mrb[7].mxu1 }
 0x2c1   :  { %v2047_v11 = vmax.f32 %v2820_v32, 0.0  ;;  %v2049_v40 = vmax.f32 %v2824_v33, 0.0  ;;  %v2822_v7 = vadd.f32 %v1957_v38, %v1221_v24  ;;  %v2826_v12 = vadd.f32 %v2043_v39, %v1229_v25 }
 0x2c2   :  { %v2050_v41 = vmax.f32 %v2821_v37, 0.0  ;;  %v2052_v43 = vmax.f32 %v2825_v9, 0.0 }
 0x2c3   :  { %v2763_v44 = vpack.c.bf16 %v2047_v11, %v2046_v8  ;;  %v2764_v45 = vpack.c.bf16 %v2049_v40, %v2048_v36  ;;  %v2051_v46 = vmax.f32 %v2822_v7, 0.0  ;;  %v2053_v47 = vmax.f32 %v2826_v12, 0.0 }
 0x2c4   :  { %v2054_v48 = vpack.c.bf16 %v2050_v41, %v2046_v8  ;;  %v2056_v49 = vpack.c.bf16 %v2052_v43, %v2048_v36 }
 0x2c5   :  { %2078 = vst [vmem:[#allocation11] sm:$0xff] %v2763_v44  ;;  %2079 = vst [vmem:[#allocation11 + $0x8] sm:$0xff] %v2764_v45  ;;  %v2055_v50 = vpack.c.bf16 %v2051_v46, %v2047_v11  ;;  %v2765_v51 = vpack.c.bf16 %v2051_v46, %v2050_v41  ;;  %v2057_v52 = vpack.c.bf16 %v2053_v47, %v2049_v40 }
 0x2c6   :  { %v2766_v53 = vpack.c.bf16 %v2053_v47, %v2052_v43 }
 0x2c7   :  { %2080 = vst [vmem:[#allocation11 + $0x10] sm:$0xff] %v2765_v51  ;;  %2377 = vmatprep.mubr.bf16.mxu0 %v2055_v50  ;;  %2418 = vmatprep.mubr.bf16.mxu1 %v2057_v52 }
 0x2c8   :  { %2081 = vst [vmem:[#allocation11 + $0x18] sm:$0xff] %v2766_v53  ;;  %2378 = vmatmul.mubr.bf16.vlgmr.msra.gmra.mrb[8].mxu0 %v2054_v48  ;;  %2419 = vmatmul.mubr.bf16.vlgmr.msra.gmra.mrb[8].mxu1 %v2056_v49 }
 0x2c9   :  { %3380 = shalt.err (!%p3377_p8)
}
 0x2ca   :  { %s3381_s20 = scalar_lea.hbm %s3621_s8, 512 }
 0x2cb   :  { %p3382_p9 = scmp.ne.s32.totalorder %s3621_s8, %s3381_s20  ;;  %p3385_p10 = scmp.lt.u32.totalorder %s3381_s20, %s3621_s8 }
 0x2cd   :  { %p3387_p11 = pnand %p3385_p10, %p3382_p9 }
 0x2cf   :  { %3390 = shalt.err (!%p3387_p11)
}
 0x2d0   :  { %2454 = dma.vmem_to_hbm [thread:$0]  %s2449_s14, 512, %s3621_s8, [#allocation12], %s3425_s17, %s3425_s17, %s3426_s18  }
 0x2d1   :  { %v2730_v56 = vld [vmem:[%s3619_s6] ss:$0 sm:$0xff]  ;;  %s3432_s8 = smov [#allocation10]  }
 0x2d2   :  { %s2436_s17 = sshll.u32 %s3432_s8, 4  ;;  %s2437_s17 = int_to_ptr.vmem [resolvable:$true] %s2436_s17 }
 0x2d3   :  { %s3391_s6 = scalar_lea.vmem %s2437_s17, 256  ;;  %p3396_p13 = scmp.lt.s32.totalorder %s2437_s17, %s2437_s17 }
 0x2d4   :  { %p3392_p12 = scmp.ne.s32.totalorder %s2437_s17, %s3391_s6  ;;  %p3397_p0 = scmp.lt.s32.totalorder %s3391_s6, %s3391_s6 }
 0x2d6   :  { %p3398_p1 = por %p3397_p0, %p3396_p13 }
 0x2d8   :  { %p3399_p2 = pnand %p3398_p1, %p3392_p12 }
 0x39b   :  { %v2783_v54 = vpop.f32.mrb[8].mxu0  ;;  %v2805_v55 = vpop.f32.mrb[8].mxu1 }
 0x39c   :  { %v2784_v57 = vpop.f32.mrb[9].mxu0  ;;  %v2806_v58 = vpop.f32.mrb[9].mxu1 }
 0x39d   :  { %v2785_v59 = vadd.f32 %v2784_v57, %v2783_v54  ;;  %v2807_v60 = vadd.f32 %v2806_v58, %v2805_v55  ;;  %v2786_v61 = vpop.f32.mrb[10].mxu0  ;;  %v2808_v62 = vpop.f32.mrb[10].mxu1 }
 0x39e   :  { %v2787_v63 = vpop.f32.mrb[11].mxu0  ;;  %v2809_v42 = vpop.f32.mrb[11].mxu1 }
 0x39f   :  { %v2380_v0 = vadd.f32 %v2785_v59, %v2730_v56  ;;  %v2788_v1 = vadd.f32 %v2787_v63, %v2786_v61  ;;  %v2810_v2 = vadd.f32 %v2809_v42, %v2808_v62 }
 0x3a1   :  { %v2421_v3 = vadd.f32 %v2807_v60, %v2380_v0  ;;  %v2383_v4 = vadd.f32 %v2788_v1, %v2730_v56 }
 0x3a3   :  { %3277 = vtanh.f32 %v2421_v3  ;;  %v2424_v5 = vadd.f32 %v2810_v2, %v2383_v4 }
 0x3a5   :  { %3279 = vtanh.f32 %v2424_v5 }
 0x3ad   :  { %v3278_v6 = vpop.eup %3277 }
 0x3ae   :  { %2429 = vst [vmem:[#allocation10] sm:$0xff] %v3278_v6 }
 0x3af   :  { %v3280_v10 = vpop.eup %3279 }
 0x3b0   :  { %2430 = vst [vmem:[#allocation10 + $0x8] sm:$0xff] %v3280_v10 }
 0x3b1   :  { %3402 = shalt.err (!%p3399_p2)
}
 0x3b2   :  { %s3403_s29 = scalar_lea.hbm %s3620_s7, 256 }
 0x3b3   :  { %p3404_p3 = scmp.ne.s32.totalorder %s3620_s7, %s3403_s29  ;;  %p3407_p4 = scmp.lt.u32.totalorder %s3403_s29, %s3620_s7 }
 0x3b5   :  { %p3409_p5 = pnand %p3407_p4, %p3404_p3 }
 0x3b7   :  { %3412 = shalt.err (!%p3409_p5)
}
 0x3b8   :  { %s3433_s10 = smov 128   ;;  %s3434_s11 = smov 8  }
 0x3b9   :  { %2442 = dma.vmem_to_hbm [thread:$0]  %s2437_s17, 256, %s3620_s7, [#allocation4], %s3433_s10, %s3433_s10, %s3434_s11  }
 0x3ba   :  { %3419 = dma.done.wait [#allocation4], 256  }
 0x3bb   :  { %3420 = vsyncadd [#allocation4], 4294967040 }
 0x3bc   :  { %3421 = dma.done.wait [#allocation12], 512  }
 0x3bd   :  { %3422 = vsyncadd [#allocation12], 4294966784 }
 0x3be   :  { %2461 = vsyncpa [#allocation3], 1 }
 0x3bf   :  { %2462 = vsyncpa [#allocation6], 1 }
 0x3c0   :  { %2463 = vsyncpa [#allocation9], 1 }
 0x3c1   :  { %2464 = vsyncpa [#allocation4], 1 }
 0x3c2   :  { %2465 = vsyncpa [#allocation12], 1 }

</bundles_post_ra>
